<compile_context>
chip_gen: v7x
topology: tpu7x:2x2x1
jax: 0.10.0
libtpu: 0.0.40
codegen_flags: <defaults>
</compile_context>

<pallas_src>
import math
import numpy as np

import jax
import jax.numpy as jnp
from jax.experimental import pallas as pl
from jax.experimental.pallas import tpu as pltpu

# ----------------------------- dimensions -----------------------------------
B = 2                     # batch size
V = 512                   # number of vertices (FLAME: 5023)
NJ = 5                    # joints (global, neck, jaw, eye_l, eye_r)
PARENTS = (-1, 0, 1, 1, 1)
SHAPE_TOTAL = 32          # stands in for 300
EXPR_TOTAL = 16           # stands in for 100
N_SHAPE = 16              # config.shape_params
N_EXPR = 8                # config.expression_params
NB = SHAPE_TOTAL + EXPR_TOTAL          # total betas (48)
NP_ = (NJ - 1) * 9                     # pose-feature dim (36)
NBP = NB + NP_                         # fused betas+pose-feature dim (84)
NLMK = 51                 # static landmarks
LPAD = 128                # landmark lane padding (fully lane-dense stores)
PR = 8                    # padded row count for the B*3 = 6 coordinate rows
NFACES = 1000
CROP = 32                 # crop_size
TEX_H = TEX_W = 32
NTEX = TEX_H * TEX_W * 3
NPC = 8                   # texture PCA components
FOV_DEG = 20.0
ZNEAR, ZFAR = 1.0, 100.0


# ----------------------------- fused Pallas kernel ---------------------------
def _flame_kernel(bp_ref, dirs_ref, vt_ref, a_ref, wT_ref, lmkT_ref,
                  camM_ref, camB_ref, texp_ref, texm_ref, texd_ref,
                  verts_ref, lmk_ref, tex_ref):
    """Blendshapes + LBS skinning + landmark projection + texture, one block.

    Every intermediate is a sublane/lane-dense slab; all sublane slices are at
    multiples of 8, so no relayout copies are generated.
    """
    # ---- 1. shape+pose blendshapes, emitted as coordinate-broadcast slabs ---
    # xyz[c*8 + 3b+i, v] = v_template[v, c] + sum_l betas_pf[b, l]*dirs[l, c, v]
    xyz = vt_ref[...] + jnp.dot(bp_ref[...], dirs_ref[...],
                                preferred_element_type=jnp.float32)    # [24, V]
    x_b = xyz[0:PR]              # posed x of batch b, broadcast over i rows
    y_b = xyz[PR:2 * PR]
    z_b = xyz[2 * PR:3 * PR]

    # ---- 2. linear blend skinning: one matmul -> four coefficient slabs -----
    # t[c*8 + 3b+i, v] = sum_j A[b,j,i,c]*lbs_w[v,j]  (+ transl[b,i] for c=3)
    t = jnp.dot(a_ref[...], wT_ref[...],
                preferred_element_type=jnp.float32)                    # [32, V]
    verts = (t[0:PR] * x_b + t[PR:2 * PR] * y_b
             + t[2 * PR:3 * PR] * z_b + t[3 * PR:4 * PR])              # [8, V]
    verts_ref[...] = verts

    # ---- 3. landmarks: bary matmul + fused camera / ndc->pix projection -----
    lm = jnp.dot(verts, lmkT_ref[...],
                 preferred_element_type=jnp.float32)                   # [8, 128]
    proj = (jnp.dot(camM_ref[...], lm, preferred_element_type=jnp.float32)
            + camB_ref[...])                                           # [16,128]
    num = proj[0:PR]         # rows 2b+k = (-CROP/2) * clip {x,y} of batch b
    den = proj[PR:2 * PR]    # rows 2b+k = clip w of batch b (padding rows = 1)
    inv = pl.reciprocal(den, approx=True)                              # EUP slot
    inv = inv * (2.0 - den * inv)          # one Newton step -> f32-exact 1/w
    lmk_ref[...] = num * inv + 0.5 * (CROP - 1.0)

    # ---- 4. texture = clip(mean/255 + params @ (dir/255), 0, 1) -------------
    tex = texm_ref[...] + jnp.dot(texp_ref[...], texd_ref[...],
                                  preferred_element_type=jnp.float32)  # [1,NTEX]
    tex_ref[...] = jnp.clip(tex, 0.0, 1.0)


def flame_fused(bp_big, dirs3, vt_big, a_flat, wT_ext, lmkT_pad,
                cam_big, cam_bias, tex_params, tex_mean_n, tex_dir_n):
    """Single pallas_call for the full FLAME vertex/landmark/texture pipeline."""
    cost = pl.CostEstimate(
        flops=2 * (3 * PR * 3 * NBP * V        # blendshape broadcast slabs
                   + 4 * PR * (NJ + 1) * V     # skinning coefficient slabs
                   + PR * V * LPAD             # landmark regression
                   + 2 * PR * PR * LPAD        # camera / ndc->pix projection
                   + NPC * NTEX),              # texture PCA
        transcendentals=PR * LPAD,             # approx reciprocals
        bytes_accessed=4 * (3 * PR * 3 * NBP + 3 * NBP * V + 3 * PR * V
                            + 4 * PR * (NJ + 1) + (NJ + 1) * V + V * LPAD
                            + 2 * PR * PR + 2 * PR * LPAD + NPC + NTEX
                            + NPC * NTEX + PR * V + PR * LPAD + NTEX))
    # TODO(synk): at real FLAME sizes (V=5023, ~436 basis rows, ~26 MB dirs3)
    # tile the V / 3V lane dimension with a grid (smaller blocks on v5e/v7x),
    # set vmem_limit_bytes explicitly, keep the constant bases VMEM-resident
    # across a batched-frame grid axis, and mark a batch/V grid axis "parallel"
    # so both v7x TensorCores are used.  At these toy sizes (~1 MB working set)
    # a single block is optimal.
    return pl.pallas_call(
        _flame_kernel,
        out_shape=(jax.ShapeDtypeStruct((PR, V), jnp.float32),
                   jax.ShapeDtypeStruct((PR, LPAD), jnp.float32),
                   jax.ShapeDtypeStruct((1, NTEX), jnp.float32)),
        grid_spec=pltpu.PrefetchScalarGridSpec(
            num_scalar_prefetch=0, grid=(1,),
            in_specs=[pl.BlockSpec((3 * PR, 3 * NBP), lambda i: (0, 0)),
                      pl.BlockSpec((3 * NBP, V), lambda i: (0, 0)),
                      pl.BlockSpec((3 * PR, V), lambda i: (0, 0)),
                      pl.BlockSpec((4 * PR, NJ + 1), lambda i: (0, 0)),
                      pl.BlockSpec((NJ + 1, V), lambda i: (0, 0)),
                      pl.BlockSpec((V, LPAD), lambda i: (0, 0)),
                      pl.BlockSpec((2 * PR, PR), lambda i: (0, 0)),
                      pl.BlockSpec((2 * PR, LPAD), lambda i: (0, 0)),
                      pl.BlockSpec((1, NPC), lambda i: (0, 0)),
                      pl.BlockSpec((1, NTEX), lambda i: (0, 0)),
                      pl.BlockSpec((NPC, NTEX), lambda i: (0, 0))],
            out_specs=[pl.BlockSpec((PR, V), lambda i: (0, 0)),
                       pl.BlockSpec((PR, LPAD), lambda i: (0, 0)),
                       pl.BlockSpec((1, NTEX), lambda i: (0, 0))]),
        compiler_params=pltpu.CompilerParams(
            dimension_semantics=("arbitrary",)),
        cost_estimate=cost,
    )(bp_big, dirs3, vt_big, a_flat, wT_ext, lmkT_pad,
      cam_big, cam_bias, tex_params, tex_mean_n, tex_dir_n)


# ----------------------------- small JAX glue (tiny, 5 joints) ---------------
def batch_rodrigues(rot_vecs):
    angle = jnp.linalg.norm(rot_vecs + 1e-8, axis=1, keepdims=True)   # [N,1]
    rot_dir = rot_vecs / angle
    cos = jnp.cos(angle)[:, None]
    sin = jnp.sin(angle)[:, None]
    rx, ry, rz = rot_dir[:, 0:1], rot_dir[:, 1:2], rot_dir[:, 2:3]
    zeros = jnp.zeros_like(rx)
    K = jnp.concatenate(
        [zeros, -rz, ry, rz, zeros, -rx, -ry, rx, zeros], axis=1
    ).reshape(-1, 3, 3)
    ident = jnp.eye(3, dtype=rot_vecs.dtype)[None]
    return ident + sin * K + (1.0 - cos) * jnp.matmul(K, K)


def batch_rigid_transform(rot_mats, joints, parents):
    Bn, N = joints.shape[:2]
    parent_idx = jnp.array(parents[1:])
    rel_joints = jnp.concatenate(
        [joints[:, :1], joints[:, 1:] - joints[:, parent_idx]], axis=1)
    top = jnp.concatenate([rot_mats, rel_joints[..., None]], axis=-1)   # [B,N,3,4]
    bottom = jnp.broadcast_to(
        jnp.array([0.0, 0.0, 0.0, 1.0], dtype=joints.dtype), (Bn, N, 1, 4))
    transforms_mat = jnp.concatenate([top, bottom], axis=2)             # [B,N,4,4]
    chain = [transforms_mat[:, 0]]
    for i in range(1, N):
        chain.append(jnp.matmul(chain[parents[i]], transforms_mat[:, i]))
    transforms = jnp.stack(chain, axis=1)
    posed_joints = transforms[:, :, :3, 3]
    joints_hom = jnp.concatenate(
        [joints, jnp.zeros((Bn, N, 1), joints.dtype)], axis=2)[..., None]
    init_bone = jnp.matmul(transforms, joints_hom)                      # [B,N,4,1]
    init_bone = jnp.concatenate(
        [jnp.zeros((Bn, N, 4, 3), joints.dtype), init_bone], axis=3)
    rel_transforms = transforms - init_bone
    return posed_joints, rel_transforms


def build_camera_matrix(dist=1.0, elev_deg=0.5, azim_deg=0.0,
                        fov_deg=FOV_DEG, znear=ZNEAR, zfar=ZFAR):
    """look_at_view_transform(1.0, 0.5, 0) + FoV perspective, row-vector 4x4."""
    elev = math.radians(elev_deg)
    azim = math.radians(azim_deg)
    C = np.array([dist * math.cos(elev) * math.sin(azim),
                  dist * math.sin(elev),
                  dist * math.cos(elev) * math.cos(azim)], dtype=np.float64)
    at = np.zeros(3)
    up = np.array([0.0, 1.0, 0.0])

    def _norm(v):
        return v / np.linalg.norm(v)

    z_axis = _norm(at - C)
    x_axis = _norm(np.cross(up, z_axis))
    y_axis = _norm(np.cross(z_axis, x_axis))
    R = np.stack([x_axis, y_axis, z_axis], axis=1)          # columns = axes
    T = -R.T @ C
    M_w2v = np.eye(4)
    M_w2v[:3, :3] = R
    M_w2v[3, :3] = T
    s = 1.0 / math.tan(math.radians(fov_deg) / 2.0)
    a = zfar / (zfar - znear)
    b = -(zfar * znear) / (zfar - znear)
    M_proj = np.array([[s, 0, 0, 0],
                       [0, s, 0, 0],
                       [0, 0, a, 1.0],
                       [0, 0, b, 0]])
    return jnp.asarray(M_w2v @ M_proj, dtype=jnp.float32)


# ----------------------------- the model -------------------------------------
class TexturedFLAMEPallas:
    def __init__(self, key, crop_size=CROP):
        self.crop_size = crop_size
        ks = jax.random.split(key, 12)
        # FLAME buffers (deterministic synthetic stand-ins for the pickle/npz).
        self.v_template = jax.random.uniform(ks[0], (V, 3), minval=-0.1, maxval=0.1)
        self.shapedirs = jax.random.normal(ks[1], (V, 3, NB)) * 0.01
        self.posedirs = jax.random.normal(ks[2], (V, 3, NP_)) * 0.01
        jreg = jax.random.uniform(ks[3], (NJ, V), minval=0.0, maxval=1.0)
        self.J_regressor = jreg / jnp.sum(jreg, axis=1, keepdims=True)
        lw = jax.random.uniform(ks[4], (V, NJ), minval=0.0, maxval=1.0)
        self.lbs_weights = lw / jnp.sum(lw, axis=1, keepdims=True)
        self.faces = jax.random.randint(ks[5], (NFACES, 3), 0, V)
        self.lmk_faces_idx = jax.random.randint(ks[6], (NLMK,), 0, NFACES)
        bc = jax.random.uniform(ks[7], (NLMK, 3), minval=0.1, maxval=1.0)
        self.lmk_bary_coords = bc / jnp.sum(bc, axis=1, keepdims=True)
        self.texture_mean = jax.random.uniform(ks[8], (1, NTEX),
                                               minval=0.0, maxval=255.0)
        self.texture_dir = jax.random.normal(ks[9], (NPC, NTEX)) * 10.0
        # Parameters (zeros, as in __init__).
        self.shape_params = jnp.zeros((1, N_SHAPE), jnp.float32)
        self.shape_betas = jnp.zeros((1, SHAPE_TOTAL - N_SHAPE), jnp.float32)
        self.expression_params = jnp.zeros((B, N_EXPR), jnp.float32)
        self.expression_betas = jnp.zeros((B, EXPR_TOTAL - N_EXPR), jnp.float32)
        self.pose_params = jnp.zeros((B, 6), jnp.float32)
        self.neck_pose = jnp.zeros((B, 3), jnp.float32)
        self.eye_pose = jnp.zeros((B, 6), jnp.float32)
        self.transl = jnp.zeros((B, 3), jnp.float32)
        self.texture_params = jnp.zeros((1, NPC), jnp.float32)
        self.use_3D_translation = True
        # Camera (look_at_view_transform(1.0, 0.5, 0) + fov=20 perspective),
        # row-vector convention: p_clip = [x, y, z, 1] @ cam_full.
        self.cam_full = build_camera_matrix()

        # ---------------- kernel-layout (slab / lane-dense) buffers -----------
        # Blendshape basis in (l, k)-interleaved form: dirs3[3l+k, v] = dirs[l,k,v].
        self.dirs3 = jnp.concatenate(
            [jnp.transpose(self.shapedirs, (2, 1, 0)),          # [NB, 3, V]
             jnp.transpose(self.posedirs, (2, 1, 0))],          # [NP_, 3, V]
            axis=0).reshape(3 * NBP, V)                         # [252, V]
        # Template replicated into the coordinate-broadcast slab layout:
        # vt_big[c*8 + r, v] = v_template[v, c]
        self.vt_big = jnp.repeat(jnp.transpose(self.v_template, (1, 0)),
                                 PR, axis=0)                    # [24, V]
        # LBS weights with an extra all-ones row (carries the transl fold).
        self.wT_ext = jnp.concatenate(
            [jnp.transpose(self.lbs_weights, (1, 0)),
             jnp.ones((1, V), jnp.float32)], axis=0)            # [NJ+1, V]
        # Joint regressor pre-contracted with the shape basis -> joints become
        # a tiny plain-JAX matmul (no per-tile accumulation in the kernel).
        self.J_template = self.J_regressor @ self.v_template    # [NJ, 3]
        self.J_shapedirs = jnp.einsum('jv,vkl->ljk',
                                      self.J_regressor, self.shapedirs)  # [NB,NJ,3]
        # Dense barycentric landmark matrix M[l, v]; lane-padded transpose.
        M = np.zeros((NLMK, V), np.float32)
        faces_np = np.asarray(self.faces)
        lf_np = np.asarray(self.lmk_faces_idx)
        bc_np = np.asarray(self.lmk_bary_coords)
        for l in range(NLMK):
            for k in range(3):
                M[l, faces_np[lf_np[l], k]] += bc_np[l, k]
        # The transl fold for landmarks is exact only because bary rows sum to 1.
        assert np.allclose(M.sum(axis=1), 1.0, atol=1e-5)
        self.lmk_mat = jnp.asarray(M)                           # [L, V] (reference)
        MT_pad = np.zeros((V, LPAD), np.float32)
        MT_pad[:, :NLMK] = M.T
        self.lmkT_pad = jnp.asarray(MT_pad)                     # [V, 128]
        # Block-diagonal camera matrix with -CROP/2 ndc->pix scale folded in:
        #   rows 0..2B-1  : scaled clip-space x/y numerators per batch
        #   rows 8..8+2B-1: clip-space w denominators (duplicated per x/y row)
        cam_np = np.asarray(self.cam_full, dtype=np.float64)
        half = CROP / 2.0
        cam_big = np.zeros((2 * PR, PR), np.float32)
        cam_bias = np.zeros((2 * PR, LPAD), np.float32)
        for b in range(B):
            for i in range(3):
                cam_big[2 * b + 0, 3 * b + i] = -half * cam_np[i, 0]
                cam_big[2 * b + 1, 3 * b + i] = -half * cam_np[i, 1]
                cam_big[PR + 2 * b + 0, 3 * b + i] = cam_np[i, 3]
                cam_big[PR + 2 * b + 1, 3 * b + i] = cam_np[i, 3]
            cam_bias[2 * b + 0, :NLMK] = -half * cam_np[3, 0]
            cam_bias[2 * b + 1, :NLMK] = -half * cam_np[3, 1]
            cam_bias[PR + 2 * b + 0, :] = 1.0
            cam_bias[PR + 2 * b + 1, :] = 1.0
            cam_bias[PR + 2 * b + 0, :NLMK] = cam_np[3, 3]
            cam_bias[PR + 2 * b + 1, :NLMK] = cam_np[3, 3]
        cam_bias[PR + 2 * B:, :] = 1.0        # denominator padding rows -> 1/1
        self.cam_big = jnp.asarray(cam_big)                     # [16, 8]
        self.cam_bias = jnp.asarray(cam_bias)                   # [16, 128]
        # Texture basis with the 1/255 normalization folded in host-side.
        self.tex_mean_n = self.texture_mean * (1.0 / 255.0)
        self.tex_dir_n = self.texture_dir * (1.0 / 255.0)
        # TODO(synk): use_face_contour dynamic landmarks and the PyTorch3D
        # rasterizer/shader pipeline are not implemented (no Pallas equivalent).

    def forward(self, shape_params=None, expression_params=None,
                pose_params=None, neck_pose=None, eye_pose=None,
                transl=None, texture_params=None):
        if shape_params is None:
            shape_params = jnp.tile(self.shape_params, (B, 1))
        if expression_params is None:
            expression_params = self.expression_params
        if pose_params is None:
            pose_params = self.pose_params
        if neck_pose is None:
            neck_pose = self.neck_pose
        if eye_pose is None:
            eye_pose = self.eye_pose
        if transl is None:
            transl = self.transl
        if texture_params is None:
            texture_params = self.texture_params

        shape_betas = jnp.tile(self.shape_betas, (B, 1))
        betas = jnp.concatenate(
            [shape_params, shape_betas, expression_params, self.expression_betas],
            axis=1)                                                      # [B, NB]
        full_pose = jnp.concatenate(
            [pose_params[:, :3], neck_pose, pose_params[:, 3:], eye_pose],
            axis=1)                                                      # [B, 15]

        rot_mats = batch_rodrigues(full_pose.reshape(-1, 3)).reshape(B, NJ, 3, 3)
        pose_feature = (rot_mats[:, 1:] - jnp.eye(3)).reshape(B, NP_)
        betas_pf = jnp.concatenate([betas, pose_feature], axis=1)        # [B, 84]

        # Blendshape LHS in the coordinate-broadcast slab layout:
        # bp_big[c*8 + 3b+i, 3l+k] = betas_pf[b, l] * (k == c)
        blk = jnp.einsum('bl,ck->cblk', betas_pf,
                         jnp.eye(3, dtype=jnp.float32))                  # [3,B,NBP,3]
        blk = jnp.repeat(blk[:, :, None], 3, axis=2).reshape(3, B * 3, 3 * NBP)
        bp_big = jnp.zeros((3, PR, 3 * NBP), jnp.float32)
        bp_big = bp_big.at[:, :B * 3, :].set(blk).reshape(3 * PR, 3 * NBP)

        # Tiny joint regression + rigid-transform chain in plain JAX.
        joints = self.J_template[None] + jnp.einsum(
            'bl,ljk->bjk', betas, self.J_shapedirs)                      # [B,NJ,3]
        _, A = batch_rigid_transform(rot_mats, joints, PARENTS)          # [B,NJ,4,4]

        # Skinning LHS in coefficient-slab layout, with transl folded into the
        # extra "ones-weight" column of the translation slab.
        Ac = jnp.transpose(A, (3, 0, 2, 1))[:, :, :3, :].reshape(4, B * 3, NJ)
        a_core = jnp.zeros((4, PR, NJ), jnp.float32).at[:, :B * 3, :].set(Ac)
        if self.use_3D_translation:
            t_vals = transl.reshape(B * 3)
        else:
            t_vals = jnp.zeros((B * 3,), jnp.float32)
        t_col = jnp.zeros((4, PR, 1), jnp.float32).at[3, :B * 3, 0].set(t_vals)
        a_flat = jnp.concatenate([a_core, t_col], axis=2).reshape(4 * PR, NJ + 1)

        # --- ONE fused Pallas call: blendshapes + LBS + landmarks + texture ---
        verts_slab, lmk_slab, tex_flat = flame_fused(
            bp_big, self.dirs3, self.vt_big, a_flat, self.wT_ext,
            self.lmkT_pad, self.cam_big, self.cam_bias,
            texture_params, self.tex_mean_n, self.tex_dir_n)

        vertices = jnp.transpose(verts_slab[:B * 3].reshape(B, 3, V), (0, 2, 1))
        landmarks = jnp.transpose(
            lmk_slab[:2 * B].reshape(B, 2, LPAD)[:, :, :NLMK], (0, 2, 1))
        texture = jnp.tile(tex_flat.reshape(1, TEX_H, TEX_W, 3), (B, 1, 1, 1))
        # TODO(synk): MeshRenderer (rasterize + Phong shade + bgr_to_rgb) has no
        # Pallas equivalent; returning the texture map as the NCHW image stand-in.
        images = jnp.transpose(texture, (0, 3, 1, 2))                    # [B,3,H,W]
        return vertices, landmarks, images


# ----------------------------- pure-JAX reference ----------------------------
def reference_forward(model, shape_params, expression_params, pose_params,
                      neck_pose, eye_pose, transl, texture_params):
    betas = jnp.concatenate(
        [shape_params, jnp.tile(model.shape_betas, (B, 1)),
         expression_params, model.expression_betas], axis=1)
    full_pose = jnp.concatenate(
        [pose_params[:, :3], neck_pose, pose_params[:, 3:], eye_pose], axis=1)
    v_shaped = model.v_template[None] + jnp.einsum(
        'bl,vkl->bvk', betas, model.shapedirs)
    J = jnp.einsum('jv,bvk->bjk', model.J_regressor, v_shaped)
    rot_mats = batch_rodrigues(full_pose.reshape(-1, 3)).reshape(B, NJ, 3, 3)
    pose_feature = (rot_mats[:, 1:] - jnp.eye(3)).reshape(B, NP_)
    pose_offsets = jnp.einsum('bp,vkp->bvk', pose_feature, model.posedirs)
    v_posed = v_shaped + pose_offsets
    _, A = batch_rigid_transform(rot_mats, J, PARENTS)
    T = jnp.einsum('vj,bjmn->bvmn', model.lbs_weights, A)
    vph = jnp.concatenate([v_posed, jnp.ones((B, V, 1))], axis=2)
    verts = jnp.einsum('bvmn,bvn->bvm', T, vph)[..., :3]
    lm = jnp.einsum('lv,bvk->blk', model.lmk_mat, verts)
    verts = verts + transl[:, None]
    lm = lm + transl[:, None]
    lm_h = jnp.concatenate([lm, jnp.ones((B, NLMK, 1))], axis=2) @ model.cam_full
    lm_ndc = -(lm_h[..., :2] / lm_h[..., 3:4])
    lm_pix = ((lm_ndc + 1.0) * CROP - 1.0) / 2.0
    tex = jnp.clip(model.texture_mean + texture_params @ model.texture_dir,
                   0.0, 255.0) / 255.0
    texture = jnp.tile(tex.reshape(1, TEX_H, TEX_W, 3), (B, 1, 1, 1))
    images = jnp.transpose(texture, (0, 3, 1, 2))
    return verts, lm_pix, images


# ----------------------------- main -------------------------------------------
if __name__ == "__main__":
    key = jax.random.PRNGKey(0)
    k_model, k_in = jax.random.split(key)
    model = TexturedFLAMEPallas(k_model, crop_size=CROP)

    ks = jax.random.split(k_in, 7)
    shape_params = jax.random.normal(ks[0], (B, N_SHAPE)) * 0.1
    expression_params = jax.random.normal(ks[1], (B, N_EXPR)) * 0.1
    pose_params = jax.random.normal(ks[2], (B, 6)) * 0.1
    neck_pose = jax.random.normal(ks[3], (B, 3)) * 0.1
    eye_pose = jax.random.normal(ks[4], (B, 6)) * 0.1
    transl = jax.random.normal(ks[5], (B, 3)) * 0.05
    texture_params = jax.random.normal(ks[6], (1, NPC)) * 0.5

    vertices, landmarks, images = model.forward(
        shape_params, expression_params, pose_params,
        neck_pose, eye_pose, transl, texture_params)
    jax.block_until_ready((vertices, landmarks, images))

    assert vertices.shape == (B, V, 3)
    assert landmarks.shape == (B, NLMK, 2)
    assert images.shape == (B, 3, CROP, CROP)

    v_ref, l_ref, im_ref = reference_forward(
        model, shape_params, expression_params, pose_params,
        neck_pose, eye_pose, transl, texture_params)
    assert np.allclose(np.asarray(vertices), np.asarray(v_ref),
                       rtol=1e-3, atol=1e-3)
    assert np.allclose(np.asarray(landmarks), np.asarray(l_ref),
                       rtol=1e-3, atol=1e-2)
    assert np.allclose(np.asarray(images), np.asarray(im_ref),
                       rtol=1e-3, atol=1e-3)
    assert np.all(np.isfinite(np.asarray(vertices)))
    print("KERNEL_OK")
</pallas_src>

<mosaic_0001>
module attributes {stable_mosaic.version = 11 : i64} {
  func.func @_flame_kernel(%arg0: i32, %arg1: memref<24x252xf32, #tpu.memory_space<vmem>>, %arg2: memref<252x512xf32, #tpu.memory_space<vmem>>, %arg3: memref<24x512xf32, #tpu.memory_space<vmem>>, %arg4: memref<32x6xf32, #tpu.memory_space<vmem>>, %arg5: memref<6x512xf32, #tpu.memory_space<vmem>>, %arg6: memref<512x128xf32, #tpu.memory_space<vmem>>, %arg7: memref<16x8xf32, #tpu.memory_space<vmem>>, %arg8: memref<16x128xf32, #tpu.memory_space<vmem>>, %arg9: memref<1x8xf32, #tpu.memory_space<vmem>>, %arg10: memref<1x3072xf32, #tpu.memory_space<vmem>>, %arg11: memref<8x3072xf32, #tpu.memory_space<vmem>>, %arg12: memref<8x512xf32, #tpu.memory_space<vmem>>, %arg13: memref<8x128xf32, #tpu.memory_space<vmem>>, %arg14: memref<1x3072xf32, #tpu.memory_space<vmem>>) attributes {dimension_semantics = [#tpu.dimension_semantics<arbitrary>], iteration_bounds = array<i64: 1>, scalar_prefetch = 0 : i64, scratch_operands = 0 : i64, tpu.core_type = #tpu.core_type<tc>, window_params = [{pipeline_mode = #tpu.pipeline_mode<synchronous>, transform_indices = @transform_0, window_bounds = array<i64: 24, 252>}, {pipeline_mode = #tpu.pipeline_mode<synchronous>, transform_indices = @transform_1, window_bounds = array<i64: 252, 512>}, {pipeline_mode = #tpu.pipeline_mode<synchronous>, transform_indices = @transform_2, window_bounds = array<i64: 24, 512>}, {pipeline_mode = #tpu.pipeline_mode<synchronous>, transform_indices = @transform_3, window_bounds = array<i64: 32, 6>}, {pipeline_mode = #tpu.pipeline_mode<synchronous>, transform_indices = @transform_4, window_bounds = array<i64: 6, 512>}, {pipeline_mode = #tpu.pipeline_mode<synchronous>, transform_indices = @transform_5, window_bounds = array<i64: 512, 128>}, {pipeline_mode = #tpu.pipeline_mode<synchronous>, transform_indices = @transform_6, window_bounds = array<i64: 16, 8>}, {pipeline_mode = #tpu.pipeline_mode<synchronous>, transform_indices = @transform_7, window_bounds = array<i64: 16, 128>}, {pipeline_mode = #tpu.pipeline_mode<synchronous>, transform_indices = @transform_8, window_bounds = array<i64: 1, 8>}, {pipeline_mode = #tpu.pipeline_mode<synchronous>, transform_indices = @transform_9, window_bounds = array<i64: 1, 3072>}, {pipeline_mode = #tpu.pipeline_mode<synchronous>, transform_indices = @transform_10, window_bounds = array<i64: 8, 3072>}, {pipeline_mode = #tpu.pipeline_mode<synchronous>, transform_indices = @transform_11, window_bounds = array<i64: 8, 512>}, {pipeline_mode = #tpu.pipeline_mode<synchronous>, transform_indices = @transform_12, window_bounds = array<i64: 8, 128>}, {pipeline_mode = #tpu.pipeline_mode<synchronous>, transform_indices = @transform_13, window_bounds = array<i64: 1, 3072>}]} {
    %c0 = arith.constant 0 : index
    %c0_0 = arith.constant 0 : index
    %0 = vector.load %arg3[%c0, %c0_0] : memref<24x512xf32, #tpu.memory_space<vmem>>, vector<24x512xf32>
    %c0_1 = arith.constant 0 : index
    %c0_2 = arith.constant 0 : index
    %1 = vector.load %arg1[%c0_1, %c0_2] : memref<24x252xf32, #tpu.memory_space<vmem>>, vector<24x252xf32>
    %c0_3 = arith.constant 0 : index
    %c0_4 = arith.constant 0 : index
    %2 = vector.load %arg2[%c0_3, %c0_4] : memref<252x512xf32, #tpu.memory_space<vmem>>, vector<252x512xf32>
    %cst = arith.constant dense<0.000000e+00> : vector<24x512xf32>
    %3 = tpu.matmul %1, %2, %cst {dimension_numbers = #tpu.dot_dimension_numbers<[1], [0], [0], [1], [0, 0, 1, 1], [], []>} : vector<24x252xf32>, vector<252x512xf32>, vector<24x512xf32> -> vector<24x512xf32>
    %4 = arith.addf %0, %3 : vector<24x512xf32>
    %5 = vector.extract_strided_slice %4 {offsets = [0, 0], sizes = [8, 512], strides = [1, 1]} : vector<24x512xf32> to vector<8x512xf32>
    %6 = vector.extract_strided_slice %4 {offsets = [8, 0], sizes = [8, 512], strides = [1, 1]} : vector<24x512xf32> to vector<8x512xf32>
    %7 = vector.extract_strided_slice %4 {offsets = [16, 0], sizes = [8, 512], strides = [1, 1]} : vector<24x512xf32> to vector<8x512xf32>
    %c0_5 = arith.constant 0 : index
    %c0_6 = arith.constant 0 : index
    %8 = vector.load %arg4[%c0_5, %c0_6] : memref<32x6xf32, #tpu.memory_space<vmem>>, vector<32x6xf32>
    %c0_7 = arith.constant 0 : index
    %c0_8 = arith.constant 0 : index
    %9 = vector.load %arg5[%c0_7, %c0_8] : memref<6x512xf32, #tpu.memory_space<vmem>>, vector<6x512xf32>
    %cst_9 = arith.constant dense<0.000000e+00> : vector<32x512xf32>
    %10 = tpu.matmul %8, %9, %cst_9 {dimension_numbers = #tpu.dot_dimension_numbers<[1], [0], [0], [1], [0, 0, 1, 1], [], []>} : vector<32x6xf32>, vector<6x512xf32>, vector<32x512xf32> -> vector<32x512xf32>
    %11 = vector.extract_strided_slice %10 {offsets = [0, 0], sizes = [8, 512], strides = [1, 1]} : vector<32x512xf32> to vector<8x512xf32>
    %12 = arith.mulf %11, %5 : vector<8x512xf32>
    %13 = vector.extract_strided_slice %10 {offsets = [8, 0], sizes = [8, 512], strides = [1, 1]} : vector<32x512xf32> to vector<8x512xf32>
    %14 = arith.mulf %13, %6 : vector<8x512xf32>
    %15 = arith.addf %12, %14 : vector<8x512xf32>
    %16 = vector.extract_strided_slice %10 {offsets = [16, 0], sizes = [8, 512], strides = [1, 1]} : vector<32x512xf32> to vector<8x512xf32>
    %17 = arith.mulf %16, %7 : vector<8x512xf32>
    %18 = arith.addf %15, %17 : vector<8x512xf32>
    %19 = vector.extract_strided_slice %10 {offsets = [24, 0], sizes = [8, 512], strides = [1, 1]} : vector<32x512xf32> to vector<8x512xf32>
    %20 = arith.addf %18, %19 : vector<8x512xf32>
    %c0_10 = arith.constant 0 : index
    %c0_11 = arith.constant 0 : index
    %21 = vector.load %arg12[%c0_10, %c0_11] : memref<8x512xf32, #tpu.memory_space<vmem>>, vector<8x512xf32>
    tpu.vector_store %arg12[%c0_10, %c0_11], %20 {strides = array<i32>} : memref<8x512xf32, #tpu.memory_space<vmem>>, vector<8x512xf32>,
    %c0_12 = arith.constant 0 : index
    %c0_13 = arith.constant 0 : index
    %22 = vector.load %arg6[%c0_12, %c0_13] : memref<512x128xf32, #tpu.memory_space<vmem>>, vector<512x128xf32>
    %cst_14 = arith.constant dense<0.000000e+00> : vector<8x128xf32>
    %23 = tpu.matmul %20, %22, %cst_14 {dimension_numbers = #tpu.dot_dimension_numbers<[1], [0], [0], [1], [0, 0, 1, 1], [], []>} : vector<8x512xf32>, vector<512x128xf32>, vector<8x128xf32> -> vector<8x128xf32>
    %c0_15 = arith.constant 0 : index
    %c0_16 = arith.constant 0 : index
    %24 = vector.load %arg7[%c0_15, %c0_16] : memref<16x8xf32, #tpu.memory_space<vmem>>, vector<16x8xf32>
    %cst_17 = arith.constant dense<0.000000e+00> : vector<16x128xf32>
    %25 = tpu.matmul %24, %23, %cst_17 {dimension_numbers = #tpu.dot_dimension_numbers<[1], [0], [0], [1], [0, 0, 1, 1], [], []>} : vector<16x8xf32>, vector<8x128xf32>, vector<16x128xf32> -> vector<16x128xf32>
    %c0_18 = arith.constant 0 : index
    %c0_19 = arith.constant 0 : index
    %26 = vector.load %arg8[%c0_18, %c0_19] : memref<16x128xf32, #tpu.memory_space<vmem>>, vector<16x128xf32>
    %27 = arith.addf %25, %26 : vector<16x128xf32>
    %28 = vector.extract_strided_slice %27 {offsets = [0, 0], sizes = [8, 128], strides = [1, 1]} : vector<16x128xf32> to vector<8x128xf32>
    %29 = vector.extract_strided_slice %27 {offsets = [8, 0], sizes = [8, 128], strides = [1, 1]} : vector<16x128xf32> to vector<8x128xf32>
    %30 = tpu.reciprocal %29 {approx = true} : vector<8x128xf32> -> vector<8x128xf32>
    %31 = arith.mulf %29, %30 : vector<8x128xf32>
    %cst_20 = arith.constant 2.000000e+00 : f32
    %32 = vector.broadcast %cst_20 : f32 to vector<8x128xf32>
    %33 = arith.subf %32, %31 : vector<8x128xf32>
    %34 = arith.mulf %30, %33 : vector<8x128xf32>
    %35 = arith.mulf %28, %34 : vector<8x128xf32>
    %cst_21 = arith.constant 1.550000e+01 : f32
    %36 = vector.broadcast %cst_21 : f32 to vector<8x128xf32>
    %37 = arith.addf %35, %36 : vector<8x128xf32>
    %c0_22 = arith.constant 0 : index
    %c0_23 = arith.constant 0 : index
    %38 = vector.load %arg13[%c0_22, %c0_23] : memref<8x128xf32, #tpu.memory_space<vmem>>, vector<8x128xf32>
    tpu.vector_store %arg13[%c0_22, %c0_23], %37 {strides = array<i32>} : memref<8x128xf32, #tpu.memory_space<vmem>>, vector<8x128xf32>,
    %c0_24 = arith.constant 0 : index
    %c0_25 = arith.constant 0 : index
    %39 = vector.load %arg10[%c0_24, %c0_25] : memref<1x3072xf32, #tpu.memory_space<vmem>>, vector<1x3072xf32>
    %c0_26 = arith.constant 0 : index
    %c0_27 = arith.constant 0 : index
    %40 = vector.load %arg9[%c0_26, %c0_27] : memref<1x8xf32, #tpu.memory_space<vmem>>, vector<1x8xf32>
    %c0_28 = arith.constant 0 : index
    %c0_29 = arith.constant 0 : index
    %41 = vector.load %arg11[%c0_28, %c0_29] : memref<8x3072xf32, #tpu.memory_space<vmem>>, vector<8x3072xf32>
    %cst_30 = arith.constant dense<0.000000e+00> : vector<1x3072xf32>
    %42 = tpu.matmul %40, %41, %cst_30 {dimension_numbers = #tpu.dot_dimension_numbers<[1], [0], [0], [1], [0, 0, 1, 1], [], []>} : vector<1x8xf32>, vector<8x3072xf32>, vector<1x3072xf32> -> vector<1x3072xf32>
    %43 = arith.addf %39, %42 : vector<1x3072xf32>
    %cst_31 = arith.constant 0.000000e+00 : f32
    %cst_32 = arith.constant 1.000000e+00 : f32
    %44 = vector.broadcast %cst_31 : f32 to vector<1x3072xf32>
    %45 = arith.maximumf %44, %43 : vector<1x3072xf32>
    %46 = vector.broadcast %cst_32 : f32 to vector<1x3072xf32>
    %47 = arith.minimumf %46, %45 : vector<1x3072xf32>
    %c0_33 = arith.constant 0 : index
    %c0_34 = arith.constant 0 : index
    %48 = vector.load %arg14[%c0_33, %c0_34] : memref<1x3072xf32, #tpu.memory_space<vmem>>, vector<1x3072xf32>
    tpu.vector_store %arg14[%c0_33, %c0_34], %47 {strides = array<i32>} : memref<1x3072xf32, #tpu.memory_space<vmem>>, vector<1x3072xf32>,
    return
  }
  func.func @transform_0(%arg0: i32) -> (i32, i32) {
    %c0_i32 = arith.constant 0 : i32
    %c0_i32_0 = arith.constant 0 : i32
    %c0_i32_1 = arith.constant 0 : i32
    return %c0_i32, %c0_i32_0 : i32, i32
  }
  func.func @transform_1(%arg0: i32) -> (i32, i32) {
    %c0_i32 = arith.constant 0 : i32
    %c0_i32_0 = arith.constant 0 : i32
    %c0_i32_1 = arith.constant 0 : i32
    return %c0_i32, %c0_i32_0 : i32, i32
  }
  func.func @transform_2(%arg0: i32) -> (i32, i32) {
    %c0_i32 = arith.constant 0 : i32
    %c0_i32_0 = arith.constant 0 : i32
    %c0_i32_1 = arith.constant 0 : i32
    return %c0_i32, %c0_i32_0 : i32, i32
  }
  func.func @transform_3(%arg0: i32) -> (i32, i32) {
    %c0_i32 = arith.constant 0 : i32
    %c0_i32_0 = arith.constant 0 : i32
    %c0_i32_1 = arith.constant 0 : i32
    return %c0_i32, %c0_i32_0 : i32, i32
  }
  func.func @transform_4(%arg0: i32) -> (i32, i32) {
    %c0_i32 = arith.constant 0 : i32
    %c0_i32_0 = arith.constant 0 : i32
    %c0_i32_1 = arith.constant 0 : i32
    return %c0_i32, %c0_i32_0 : i32, i32
  }
  func.func @transform_5(%arg0: i32) -> (i32, i32) {
    %c0_i32 = arith.constant 0 : i32
    %c0_i32_0 = arith.constant 0 : i32
    %c0_i32_1 = arith.constant 0 : i32
    return %c0_i32, %c0_i32_0 : i32, i32
  }
  func.func @transform_6(%arg0: i32) -> (i32, i32) {
    %c0_i32 = arith.constant 0 : i32
    %c0_i32_0 = arith.constant 0 : i32
    %c0_i32_1 = arith.constant 0 : i32
    return %c0_i32, %c0_i32_0 : i32, i32
  }
  func.func @transform_7(%arg0: i32) -> (i32, i32) {
    %c0_i32 = arith.constant 0 : i32
    %c0_i32_0 = arith.constant 0 : i32
    %c0_i32_1 = arith.constant 0 : i32
    return %c0_i32, %c0_i32_0 : i32, i32
  }
  func.func @transform_8(%arg0: i32) -> (i32, i32) {
    %c0_i32 = arith.constant 0 : i32
    %c0_i32_0 = arith.constant 0 : i32
    %c0_i32_1 = arith.constant 0 : i32
    return %c0_i32, %c0_i32_0 : i32, i32
  }
  func.func @transform_9(%arg0: i32) -> (i32, i32) {
    %c0_i32 = arith.constant 0 : i32
    %c0_i32_0 = arith.constant 0 : i32
    %c0_i32_1 = arith.constant 0 : i32
    return %c0_i32, %c0_i32_0 : i32, i32
  }
  func.func @transform_10(%arg0: i32) -> (i32, i32) {
    %c0_i32 = arith.constant 0 : i32
    %c0_i32_0 = arith.constant 0 : i32
    %c0_i32_1 = arith.constant 0 : i32
    return %c0_i32, %c0_i32_0 : i32, i32
  }
  func.func @transform_11(%arg0: i32) -> (i32, i32) {
    %c0_i32 = arith.constant 0 : i32
    %c0_i32_0 = arith.constant 0 : i32
    %c0_i32_1 = arith.constant 0 : i32
    return %c0_i32, %c0_i32_0 : i32, i32
  }
  func.func @transform_12(%arg0: i32) -> (i32, i32) {
    %c0_i32 = arith.constant 0 : i32
    %c0_i32_0 = arith.constant 0 : i32
    %c0_i32_1 = arith.constant 0 : i32
    return %c0_i32, %c0_i32_0 : i32, i32
  }
  func.func @transform_13(%arg0: i32) -> (i32, i32) {
    %c0_i32 = arith.constant 0 : i32
    %c0_i32_0 = arith.constant 0 : i32
    %c0_i32_1 = arith.constant 0 : i32
    return %c0_i32, %c0_i32_0 : i32, i32
  }
}

</mosaic_0001>

<bundles_post_ra>
// kernel: tpu_custom_call.1
= control target key start
LH: loop header
LB: loop body
LE: loop exit
PB: predicated region body
PF: predicated region fallthrough
CT: control target
= control target key end

     0   :  { %19 = vsyncpa [#allocation3], 0  ;;  %s2984_s0 = inlined_call_operand.vmem [shape: f32[24,252], index: 0, kind: input, shape index: {}]   ;;  %s2985_s1 = inlined_call_operand.hbm [shape: f32[252,512], index: 1, kind: input, shape index: {}]   ;;  %s2986_s2 = inlined_call_operand.hbm [shape: f32[24,512], index: 2, kind: input, shape index: {}]   ;;  %s2987_s3 = inlined_call_operand.vmem [shape: f32[32,6], index: 3, kind: input, shape index: {}]   ;;  %s2988_s4 = inlined_call_operand.hbm [shape: f32[6,512], index: 4, kind: input, shape index: {}]   ;;  %s2989_s5 = inlined_call_operand.hbm [shape: f32[512,128], index: 5, kind: input, shape index: {}]   ;;  %s2990_s6 = inlined_call_operand.vmem [shape: f32[16,8], index: 6, kind: input, shape index: {}]   ;;  %s2991_s7 = inlined_call_operand.vmem [shape: f32[16,128], index: 7, kind: input, shape index: {}]   ;;  %s2992_s8 = inlined_call_operand.vmem [shape: f32[1,8], index: 8, kind: input, shape index: {}]   ;;  %s2993_s9 = inlined_call_operand.vmem [shape: f32[1,3072], index: 9, kind: input, shape index: {}]   ;;  %s2994_s10 = inlined_call_operand.hbm [shape: f32[8,3072], index: 10, kind: input, shape index: {}]   ;;  %s2995_s11 = inlined_call_operand.hbm [shape: f32[8,512], index: 11, kind: output, shape index: {0}]   ;;  %s2996_s12 = inlined_call_operand.hbm [shape: f32[8,128], index: 12, kind: output, shape index: {1}]   ;;  %s2997_s13 = inlined_call_operand.hbm [shape: f32[1,3072], index: 13, kind: output, shape index: {2}]  }
   0x1   :  { %20 = vsyncpa [#allocation6], 0 }
   0x2   :  { %21 = vsyncpa [#allocation9], 0 }
   0x3   :  { %22 = vsyncpa [#allocation4], 0 }
   0x4   :  { %23 = vsyncpa [#allocation13], 0  ;;  %s2617_s25 = smov [#allocation5]   ;;  %s2618_s27 = smov [#allocation8]  }
   0x5   :  { %s43_s26 = sshll.u32 %s2617_s25, 4  ;;  %s67_s28 = sshll.u32 %s2618_s27, 4  ;;  %s44_s26 = int_to_ptr.vmem [resolvable:$true] %s43_s26  ;;  %s2702_s28 = int_to_ptr.vmem [resolvable:$true] %s67_s28 }
   0x6   :  { %s2431_s14 = scalar_lea.hbm %s2986_s2, 1536 }
   0x7   :  { %p2432_p0 = scmp.ne.s32.totalorder %s2986_s2, %s2431_s14  ;;  %p2435_p1 = scmp.lt.u32.totalorder %s2431_s14, %s2986_s2 }
   0x9   :  { %p2437_p2 = pnand %p2435_p1, %p2432_p0 }
   0xb   :  { %2440 = shalt.err (!%p2437_p2)
}
   0xc   :  { %s2441_s19 = scalar_lea.vmem %s44_s26, 1536  ;;  %p2446_p4 = scmp.lt.s32.totalorder %s44_s26, %s44_s26 }
   0xd   :  { %p2442_p3 = scmp.ne.s32.totalorder %s44_s26, %s2441_s19  ;;  %p2447_p5 = scmp.lt.s32.totalorder %s2441_s19, %s2441_s19 }
   0xf   :  { %p2448_p6 = por %p2447_p5, %p2446_p4 }
  0x11   :  { %p2449_p7 = pnand %p2448_p6, %p2442_p3 }
  0x13   :  { %2452 = shalt.err (!%p2449_p7)
}
  0x14   :  { %s2619_s20 = smov 512   ;;  %s2620_s21 = smov 32  }
  0x15   :  { %49 = dma.hbm_to_vmem [thread:$0]  %s2986_s2, 1536, %s44_s26, [#allocation6], %s2619_s20, %s2619_s20, %s2620_s21  }
  0x16   :  { %s2453_s27 = scalar_lea.hbm %s2989_s5, 8192 }
  0x17   :  { %p2454_p8 = scmp.ne.s32.totalorder %s2989_s5, %s2453_s27  ;;  %p2457_p9 = scmp.lt.u32.totalorder %s2453_s27, %s2989_s5 }
  0x19   :  { %p2459_p10 = pnand %p2457_p9, %p2454_p8 }
  0x1b   :  { %2462 = shalt.err (!%p2459_p10)
}
  0x1c   :  { %s2463_s16 = scalar_lea.vmem %s2702_s28, 8192  ;;  %p2468_p12 = scmp.lt.s32.totalorder %s2702_s28, %s2702_s28 }
  0x1d   :  { %p2464_p11 = scmp.ne.s32.totalorder %s2702_s28, %s2463_s16  ;;  %p2469_p13 = scmp.lt.s32.totalorder %s2463_s16, %s2463_s16 }
  0x1f   :  { %p2470_p0 = por %p2469_p13, %p2468_p12 }
  0x21   :  { %p2471_p1 = pnand %p2470_p0, %p2464_p11 }
  0x23   :  { %2474 = shalt.err (!%p2471_p1)
}
  0x24   :  { %s2621_s2 = smov 128   ;;  %s2622_s26 = smov 8  }
  0x25   :  { %73 = dma.hbm_to_vmem [thread:$0]  %s2989_s5, 8192, %s2702_s28, [#allocation9], %s2621_s2, %s2621_s2, %s2622_s26  }
  0x26   :  { %s2623_s19 = smov [#allocation2]   ;;  %s2624_s23 = smov [#allocation7]  }
  0x27   :  { %s31_s22 = sshll.u32 %s2623_s19, 4  ;;  %s58_s24 = sshll.u32 %s2624_s23, 4  ;;  %s32_s22 = int_to_ptr.vmem [resolvable:$true] %s31_s22  ;;  %s59_s24 = int_to_ptr.vmem [resolvable:$true] %s58_s24 }
  0x28   :  { %s2475_s29 = scalar_lea.hbm %s2985_s1, 16384 }
  0x29   :  { %p2476_p2 = scmp.ne.s32.totalorder %s2985_s1, %s2475_s29  ;;  %p2479_p3 = scmp.lt.u32.totalorder %s2475_s29, %s2985_s1 }
  0x2b   :  { %p2481_p4 = pnand %p2479_p3, %p2476_p2 }
  0x2d   :  { %2484 = shalt.err (!%p2481_p4)
}
  0x2e   :  { %s2485_s5 = scalar_lea.vmem %s32_s22, 16384  ;;  %p2490_p6 = scmp.lt.s32.totalorder %s32_s22, %s32_s22 }
  0x2f   :  { %p2486_p5 = scmp.ne.s32.totalorder %s32_s22, %s2485_s5  ;;  %p2491_p7 = scmp.lt.s32.totalorder %s2485_s5, %s2485_s5 }
  0x31   :  { %p2492_p8 = por %p2491_p7, %p2490_p6 }
  0x33   :  { %p2493_p9 = pnand %p2492_p8, %p2486_p5 }
  0x35   :  { %2496 = shalt.err (!%p2493_p9)
}
  0x36   :  { %37 = dma.hbm_to_vmem [thread:$0]  %s2985_s1, 16384, %s32_s22, [#allocation3], %s2619_s20, %s2619_s20, %s2620_s21  }
  0x37   :  { %s2497_s18 = scalar_lea.hbm %s2988_s4, 512 }
  0x38   :  { %p2498_p10 = scmp.ne.s32.totalorder %s2988_s4, %s2497_s18  ;;  %p2501_p11 = scmp.lt.u32.totalorder %s2497_s18, %s2988_s4 }
  0x3a   :  { %p2503_p12 = pnand %p2501_p11, %p2498_p10 }
  0x3c   :  { %2506 = shalt.err (!%p2503_p12)
}
  0x3d   :  { %s2507_s29 = scalar_lea.vmem %s59_s24, 512  ;;  %p2512_p0 = scmp.lt.s32.totalorder %s59_s24, %s59_s24 }
  0x3e   :  { %p2508_p13 = scmp.ne.s32.totalorder %s59_s24, %s2507_s29  ;;  %p2513_p1 = scmp.lt.s32.totalorder %s2507_s29, %s2507_s29 }
  0x40   :  { %p2514_p2 = por %p2513_p1, %p2512_p0 }
  0x42   :  { %p2515_p3 = pnand %p2514_p2, %p2508_p13 }
  0x44   :  { %2518 = shalt.err (!%p2515_p3)
}
  0x45   :  { %61 = dma.hbm_to_vmem [thread:$0]  %s2988_s4, 512, %s59_s24, [#allocation6]  }
  0x46   :  { %s2625_s21 = smov [#allocation10]   ;;  %s2519_s15 = scalar_lea.hbm %s2994_s10, 3072 }
  0x47   :  { %s88_s22 = sshll.u32 %s2625_s21, 4  ;;  %p2520_p4 = scmp.ne.s32.totalorder %s2994_s10, %s2519_s15  ;;  %s89_s22 = int_to_ptr.vmem [resolvable:$true] %s88_s22 }
  0x48   :  { %p2523_p5 = scmp.lt.u32.totalorder %s2519_s15, %s2994_s10 }
  0x4a   :  { %p2525_p6 = pnand %p2523_p5, %p2520_p4 }
  0x4c   :  { %2528 = shalt.err (!%p2525_p6)
}
  0x4d   :  { %s2529_s26 = scalar_lea.vmem %s89_s22, 3072  ;;  %p2534_p8 = scmp.lt.s32.totalorder %s89_s22, %s89_s22 }
  0x4e   :  { %p2530_p7 = scmp.ne.s32.totalorder %s89_s22, %s2529_s26  ;;  %p2535_p9 = scmp.lt.s32.totalorder %s2529_s26, %s2529_s26 }
  0x50   :  { %p2536_p10 = por %p2535_p9, %p2534_p8 }
  0x52   :  { %p2537_p11 = pnand %p2536_p10, %p2530_p7 }
  0x54   :  { %2540 = shalt.err (!%p2537_p11)
}
  0x55   :  { %91 = dma.hbm_to_vmem [thread:$0]  %s2994_s10, 3072, %s89_s22, [#allocation9]  }
  0x56   :  { %2607 = dma.done.wait [#allocation3], 16384  }
  0x57   :  { %2608 = vsyncadd [#allocation3], 4294950912 }
  0x58   :  { %2609 = dma.done.wait [#allocation6], 2048  }
  0x59   :  { %2610 = vsyncadd [#allocation6], 4294965248 }
  0x5a   :  { %2611 = dma.done.wait [#allocation9], 11264  }
  0x5b   :  { %2612 = vsyncadd [#allocation9], 4294956032  ;;  %v126_v0 = vld [vmem:[#allocation2 + $0x8] sm:$0xff]  ;;  %v128_v2 = vld [vmem:[#allocation2 + $0x18] sm:$0xff]  ;;  %vm253_vm0 = vcmask 1014784   ;;  %vm263_vm1 = vcmask 1043456  }
  0x5c   :  { %v130_v1 = vld [vmem:[#allocation2 + $0x28] sm:$0xff]  ;;  %v132_v4 = vld [vmem:[#allocation2 + $0x38] sm:$0xff]  ;;  %v125_v5 = vld [vmem:[#allocation2] sm:$0xff]  ;;  %vm2626_vm2 = vmmov 1   ;;  %vm475_vm4 = vcmask 1045504   ;;  %vm462_vm5 = vcmask 48128  }
  0x5d   :  { %v2218_v3 = vpack.c.bf16 %v130_v1, %v126_v0  ;;  %v129_v6 = vld [vmem:[#allocation2 + $0x20] sm:$0xff]  ;;  %v2284_v7 = vpack.c.bf16 %v132_v4, %v128_v2  ;;  %v127_v9 = vld [vmem:[#allocation2 + $0x10] sm:$0xff]  ;;  %v134_v11 = vld [vmem:[#allocation2 + $0x48] sm:$0xff]  ;;  %vm902_vm6 = vcmask 64512  }
  0x5e   :  { %v2220_v8 = vpack.c.bf16 %v129_v6, %v125_v5  ;;  %v131_v10 = vld [vmem:[#allocation2 + $0x30] sm:$0xff]  ;;  %v138_v13 = vld [vmem:[#allocation2 + $0x68] sm:$0xff]  ;;  %v136_v14 = vld [vmem:[#allocation2 + $0x58] sm:$0xff] }
  0x5f   :  { %2219 = vmatprep.subr.bf16.mxu0 %v2218_v3  ;;  %v2286_v12 = vpack.c.bf16 %v131_v10, %v127_v9  ;;  %v140_v15 = vld [vmem:[#allocation2 + $0x78] sm:$0xff]  ;;  %2285 = vmatprep.subr.bf16.mxu1 %v2284_v7  ;;  %v2222_v16 = vpack.c.bf16 %v138_v13, %v134_v11  ;;  %v133_v18 = vld [vmem:[#allocation2 + $0x40] sm:$0xff]  ;;  %v135_v20 = vld [vmem:[#allocation2 + $0x50] sm:$0xff] }
  0x60   :  { %2221 = vmatpush1.bf16.msra.mxu0 %v2220_v8  ;;  %v2288_v17 = vpack.c.bf16 %v140_v15, %v136_v14  ;;  %v137_v19 = vld [vmem:[#allocation2 + $0x60] sm:$0xff]  ;;  %v139_v22 = vld [vmem:[#allocation2 + $0x70] sm:$0xff]  ;;  %v142_v23 = vld [vmem:[#allocation2 + $0x88] sm:$0xff] }
  0x61   :  { %2287 = vmatpush1.bf16.msra.mxu1 %v2286_v12  ;;  %v2224_v21 = vpack.c.bf16 %v137_v19, %v133_v18  ;;  %v146_v24 = vld [vmem:[#allocation2 + $0xa8] sm:$0xff]  ;;  %2223 = vmatprep.subr.bf16.mxu0 %v2222_v16  ;;  %v2290_v25 = vpack.c.bf16 %v139_v22, %v135_v20  ;;  %v144_v27 = vld [vmem:[#allocation2 + $0x98] sm:$0xff]  ;;  %v141_v29 = vld [vmem:[#allocation2 + $0x80] sm:$0xff] }
  0x62   :  { %2289 = vmatprep.subr.bf16.mxu1 %v2288_v17  ;;  %v2226_v26 = vpack.c.bf16 %v146_v24, %v142_v23  ;;  %v148_v28 = vld [vmem:[#allocation2 + $0xb8] sm:$0xff]  ;;  %v145_v31 = vld [vmem:[#allocation2 + $0xa0] sm:$0xff]  ;;  %v143_v32 = vld [vmem:[#allocation2 + $0x90] sm:$0xff] }
  0x63   :  { %v2292_v30 = vpack.c.bf16 %v148_v28, %v144_v27  ;;  %v147_v33 = vld [vmem:[#allocation2 + $0xb0] sm:$0xff]  ;;  %v2228_v34 = vpack.c.bf16 %v145_v31, %v141_v29  ;;  %v150_v35 = vld [vmem:[#allocation2 + $0xc8] sm:$0xff]  ;;  %v152_v37 = vld [vmem:[#allocation2 + $0xd8] sm:$0xff] }
  0x64   :  { %2225 = vmatpush1.bf16.msra.mxu0 %v2224_v21  ;;  %v154_v36 = vld [vmem:[#allocation2 + $0xe8] sm:$0xff]  ;;  %v2294_v38 = vpack.c.bf16 %v147_v33, %v143_v32  ;;  %v156_v40 = vld [vmem:[#allocation2 + $0xf8] sm:$0xff]  ;;  %v149_v41 = vld [vmem:[#allocation2 + $0xc0] sm:$0xff] }
  0x65   :  { %2291 = vmatpush1.bf16.msra.mxu1 %v2290_v25  ;;  %2227 = vmatprep.subr.bf16.mxu0 %v2226_v26  ;;  %v2230_v39 = vpack.c.bf16 %v154_v36, %v150_v35  ;;  %v153_v42 = vld [vmem:[#allocation2 + $0xe0] sm:$0xff]  ;;  %v2296_v43 = vpack.c.bf16 %v156_v40, %v152_v37  ;;  %v151_v44 = vld [vmem:[#allocation2 + $0xd0] sm:$0xff]  ;;  %v158_v46 = vld [vmem:[#allocation2 + $0x108] sm:$0xff] }
  0x66   :  { %2293 = vmatprep.subr.bf16.mxu1 %v2292_v30  ;;  %v155_v45 = vld [vmem:[#allocation2 + $0xf0] sm:$0xff]  ;;  %v162_v47 = vld [vmem:[#allocation2 + $0x128] sm:$0xff]  ;;  %v160_v48 = vld [vmem:[#allocation2 + $0x118] sm:$0xff]  ;;  %v2232_v50 = vpack.c.bf16 %v153_v42, %v149_v41 }
  0x67   :  { %v164_v49 = vld [vmem:[#allocation2 + $0x138] sm:$0xff]  ;;  %v2298_v51 = vpack.c.bf16 %v155_v45, %v151_v44  ;;  %v2234_v52 = vpack.c.bf16 %v162_v47, %v158_v46  ;;  %v157_v53 = vld [vmem:[#allocation2 + $0x100] sm:$0xff]  ;;  %v159_v55 = vld [vmem:[#allocation2 + $0x110] sm:$0xff] }
  0x68   :  { %2229 = vmatpush1.bf16.msra.mxu0 %v2228_v34  ;;  %v161_v54 = vld [vmem:[#allocation2 + $0x120] sm:$0xff]  ;;  %v2300_v56 = vpack.c.bf16 %v164_v49, %v160_v48  ;;  %v163_v57 = vld [vmem:[#allocation2 + $0x130] sm:$0xff]  ;;  %v166_v58 = vld [vmem:[#allocation2 + $0x148] sm:$0xff] }
  0x69   :  { %2295 = vmatpush1.bf16.msra.mxu1 %v2294_v38  ;;  %2231 = vmatprep.subr.bf16.mxu0 %v2230_v39  ;;  %v170_v59 = vld [vmem:[#allocation2 + $0x168] sm:$0xff]  ;;  %v168_v60 = vld [vmem:[#allocation2 + $0x158] sm:$0xff]  ;;  %v2236_v62 = vpack.c.bf16 %v161_v54, %v157_v53  ;;  %v2302_v63 = vpack.c.bf16 %v163_v57, %v159_v55  ;;  %v165_v1 = vld [vmem:[#allocation2 + $0x140] sm:$0xff] }
  0x6a   :  { %2297 = vmatprep.subr.bf16.mxu1 %v2296_v43  ;;  %v172_v61 = vld [vmem:[#allocation2 + $0x178] sm:$0xff]  ;;  %v2238_v0 = vpack.c.bf16 %v170_v59, %v166_v58  ;;  %v169_v2 = vld [vmem:[#allocation2 + $0x160] sm:$0xff]  ;;  %v167_v3 = vld [vmem:[#allocation2 + $0x150] sm:$0xff] }
  0x6b   :  { %v2304_v4 = vpack.c.bf16 %v172_v61, %v168_v60  ;;  %v171_v5 = vld [vmem:[#allocation2 + $0x170] sm:$0xff]  ;;  %v174_v6 = vld [vmem:[#allocation2 + $0x188] sm:$0xff]  ;;  %v176_v8 = vld [vmem:[#allocation2 + $0x198] sm:$0xff]  ;;  %v2240_v10 = vpack.c.bf16 %v169_v2, %v165_v1 }
  0x6c   :  { %2233 = vmatpush1.bf16.msra.mxu0 %v2232_v50  ;;  %v178_v7 = vld [vmem:[#allocation2 + $0x1a8] sm:$0xff]  ;;  %v180_v9 = vld [vmem:[#allocation2 + $0x1b8] sm:$0xff]  ;;  %v2306_v11 = vpack.c.bf16 %v171_v5, %v167_v3  ;;  %v173_v13 = vld [vmem:[#allocation2 + $0x180] sm:$0xff] }
  0x6d   :  { %2299 = vmatpush1.bf16.msra.mxu1 %v2298_v51  ;;  %2235 = vmatprep.subr.bf16.mxu0 %v2234_v52  ;;  %v2242_v12 = vpack.c.bf16 %v178_v7, %v174_v6  ;;  %v177_v14 = vld [vmem:[#allocation2 + $0x1a0] sm:$0xff]  ;;  %v175_v15 = vld [vmem:[#allocation2 + $0x190] sm:$0xff]  ;;  %v2308_v16 = vpack.c.bf16 %v180_v9, %v176_v8  ;;  %v182_v18 = vld [vmem:[#allocation2 + $0x1c8] sm:$0xff] }
  0x6e   :  { %2301 = vmatprep.subr.bf16.mxu1 %v2300_v56  ;;  %v179_v17 = vld [vmem:[#allocation2 + $0x1b0] sm:$0xff]  ;;  %v186_v19 = vld [vmem:[#allocation2 + $0x1e8] sm:$0xff]  ;;  %v184_v20 = vld [vmem:[#allocation2 + $0x1d8] sm:$0xff]  ;;  %v2244_v22 = vpack.c.bf16 %v177_v14, %v173_v13 }
  0x6f   :  { %v188_v21 = vld [vmem:[#allocation2 + $0x1f8] sm:$0xff]  ;;  %v2310_v23 = vpack.c.bf16 %v179_v17, %v175_v15  ;;  %v2246_v24 = vpack.c.bf16 %v186_v19, %v182_v18  ;;  %v181_v25 = vld [vmem:[#allocation2 + $0x1c0] sm:$0xff]  ;;  %v183_v27 = vld [vmem:[#allocation2 + $0x1d0] sm:$0xff] }
  0x70   :  { %2237 = vmatpush1.bf16.msra.mxu0 %v2236_v62  ;;  %v185_v26 = vld [vmem:[#allocation2 + $0x1e0] sm:$0xff]  ;;  %v2312_v28 = vpack.c.bf16 %v188_v21, %v184_v20  ;;  %v187_v29 = vld [vmem:[#allocation2 + $0x1f0] sm:$0xff]  ;;  %v190_v30 = vld [vmem:[#allocation2 + $0x208] sm:$0xff] }
  0x71   :  { %2303 = vmatpush1.bf16.msra.mxu1 %v2302_v63  ;;  %2239 = vmatprep.subr.bf16.mxu0 %v2238_v0  ;;  %v194_v31 = vld [vmem:[#allocation2 + $0x228] sm:$0xff]  ;;  %v192_v32 = vld [vmem:[#allocation2 + $0x218] sm:$0xff]  ;;  %v2248_v34 = vpack.c.bf16 %v185_v26, %v181_v25  ;;  %v2314_v35 = vpack.c.bf16 %v187_v29, %v183_v27  ;;  %v189_v37 = vld [vmem:[#allocation2 + $0x200] sm:$0xff] }
  0x72   :  { %2305 = vmatprep.subr.bf16.mxu1 %v2304_v4  ;;  %v196_v33 = vld [vmem:[#allocation2 + $0x238] sm:$0xff]  ;;  %v2250_v36 = vpack.c.bf16 %v194_v31, %v190_v30  ;;  %v193_v38 = vld [vmem:[#allocation2 + $0x220] sm:$0xff]  ;;  %v191_v39 = vld [vmem:[#allocation2 + $0x210] sm:$0xff] }
  0x73   :  { %v2316_v40 = vpack.c.bf16 %v196_v33, %v192_v32  ;;  %v195_v41 = vld [vmem:[#allocation2 + $0x230] sm:$0xff]  ;;  %v198_v42 = vld [vmem:[#allocation2 + $0x248] sm:$0xff]  ;;  %v200_v44 = vld [vmem:[#allocation2 + $0x258] sm:$0xff]  ;;  %v2252_v46 = vpack.c.bf16 %v193_v38, %v189_v37 }
  0x74   :  { %2241 = vmatpush1.bf16.msra.mxu0 %v2240_v10  ;;  %v202_v43 = vld [vmem:[#allocation2 + $0x268] sm:$0xff]  ;;  %v204_v45 = vld [vmem:[#allocation2 + $0x278] sm:$0xff]  ;;  %v2318_v47 = vpack.c.bf16 %v195_v41, %v191_v39  ;;  %v197_v49 = vld [vmem:[#allocation2 + $0x240] sm:$0xff] }
  0x75   :  { %2307 = vmatpush1.bf16.msra.mxu1 %v2306_v11  ;;  %2243 = vmatprep.subr.bf16.mxu0 %v2242_v12  ;;  %v2254_v48 = vpack.c.bf16 %v202_v43, %v198_v42  ;;  %v201_v50 = vld [vmem:[#allocation2 + $0x260] sm:$0xff]  ;;  %v199_v51 = vld [vmem:[#allocation2 + $0x250] sm:$0xff]  ;;  %v2320_v52 = vpack.c.bf16 %v204_v45, %v200_v44  ;;  %v206_v54 = vld [vmem:[#allocation2 + $0x288] sm:$0xff] }
  0x76   :  { %2309 = vmatprep.subr.bf16.mxu1 %v2308_v16  ;;  %v203_v53 = vld [vmem:[#allocation2 + $0x270] sm:$0xff]  ;;  %v210_v55 = vld [vmem:[#allocation2 + $0x2a8] sm:$0xff]  ;;  %v208_v56 = vld [vmem:[#allocation2 + $0x298] sm:$0xff]  ;;  %v2256_v58 = vpack.c.bf16 %v201_v50, %v197_v49 }
  0x77   :  { %v212_v57 = vld [vmem:[#allocation2 + $0x2b8] sm:$0xff]  ;;  %v2322_v59 = vpack.c.bf16 %v203_v53, %v199_v51  ;;  %v2258_v60 = vpack.c.bf16 %v210_v55, %v206_v54  ;;  %v205_v61 = vld [vmem:[#allocation2 + $0x280] sm:$0xff]  ;;  %v207_v63 = vld [vmem:[#allocation2 + $0x290] sm:$0xff] }
  0x78   :  { %2245 = vmatpush1.bf16.msra.mxu0 %v2244_v22  ;;  %v209_v62 = vld [vmem:[#allocation2 + $0x2a0] sm:$0xff]  ;;  %v2324_v0 = vpack.c.bf16 %v212_v57, %v208_v56  ;;  %v211_v1 = vld [vmem:[#allocation2 + $0x2b0] sm:$0xff]  ;;  %v214_v2 = vld [vmem:[#allocation2 + $0x2c8] sm:$0xff] }
  0x79   :  { %2311 = vmatpush1.bf16.msra.mxu1 %v2310_v23  ;;  %2247 = vmatprep.subr.bf16.mxu0 %v2246_v24  ;;  %v218_v3 = vld [vmem:[#allocation2 + $0x2e8] sm:$0xff]  ;;  %v216_v4 = vld [vmem:[#allocation2 + $0x2d8] sm:$0xff]  ;;  %v2260_v6 = vpack.c.bf16 %v209_v62, %v205_v61  ;;  %v213_v7 = vld [vmem:[#allocation2 + $0x2c0] sm:$0xff]  ;;  %v2326_v8 = vpack.c.bf16 %v211_v1, %v207_v63 }
  0x7a   :  { %2313 = vmatprep.subr.bf16.mxu1 %v2312_v28  ;;  %v220_v5 = vld [vmem:[#allocation2 + $0x2f8] sm:$0xff]  ;;  %v2262_v9 = vpack.c.bf16 %v218_v3, %v214_v2  ;;  %v217_v10 = vld [vmem:[#allocation2 + $0x2e0] sm:$0xff]  ;;  %v215_v11 = vld [vmem:[#allocation2 + $0x2d0] sm:$0xff] }
  0x7b   :  { %v219_v12 = vld [vmem:[#allocation2 + $0x2f0] sm:$0xff]  ;;  %v2328_v13 = vpack.c.bf16 %v220_v5, %v216_v4  ;;  %v222_v14 = vld [vmem:[#allocation2 + $0x308] sm:$0xff]  ;;  %v224_v17 = vld [vmem:[#allocation2 + $0x318] sm:$0xff]  ;;  %v2264_v19 = vpack.c.bf16 %v217_v10, %v213_v7 }
  0x7c   :  { %2249 = vmatpush1.bf16.msra.mxu0 %v2248_v34  ;;  %v226_v15 = vld [vmem:[#allocation2 + $0x328] sm:$0xff]  ;;  %v228_v18 = vld [vmem:[#allocation2 + $0x338] sm:$0xff]  ;;  %v2330_v20 = vpack.c.bf16 %v219_v12, %v215_v11  ;;  %v221_v22 = vld [vmem:[#allocation2 + $0x300] sm:$0xff] }
  0x7d   :  { %2315 = vmatpush1.bf16.msra.mxu1 %v2314_v35  ;;  %2251 = vmatprep.subr.bf16.mxu0 %v2250_v36  ;;  %v120_v16 = vld [vmem:[%s2984_s0 + $0x8] sm:$0xff]  ;;  %v2266_v21 = vpack.c.bf16 %v226_v15, %v222_v14  ;;  %v225_v23 = vld [vmem:[#allocation2 + $0x320] sm:$0xff]  ;;  %v223_v24 = vld [vmem:[#allocation2 + $0x310] sm:$0xff]  ;;  %v2332_v25 = vpack.c.bf16 %v228_v18, %v224_v17 }
  0x7e   :  { %2317 = vmatprep.subr.bf16.mxu1 %v2316_v40  ;;  %2106 = vmatprep.mubr.msk.f32.mxu0 %vm253_vm0, %v120_v16  ;;  %v227_v26 = vld [vmem:[#allocation2 + $0x330] sm:$0xff]  ;;  %v230_v27 = vld [vmem:[#allocation2 + $0x348] sm:$0xff]  ;;  %v232_v29 = vld [vmem:[#allocation2 + $0x358] sm:$0xff]  ;;  %v2268_v31 = vpack.c.bf16 %v225_v23, %v221_v22 }
  0x7f   :  { %2111 = vmatprep.mubr.msk.f32.mxu1 %vm253_vm0, %v120_v16  ;;  %v234_v28 = vld [vmem:[#allocation2 + $0x368] sm:$0xff]  ;;  %v236_v30 = vld [vmem:[#allocation2 + $0x378] sm:$0xff]  ;;  %v2334_v32 = vpack.c.bf16 %v227_v26, %v223_v24  ;;  %v229_v34 = vld [vmem:[#allocation2 + $0x340] sm:$0xff] }
  0x80   :  { %2253 = vmatpush1.bf16.msra.mxu0 %v2252_v46  ;;  %v2270_v33 = vpack.c.bf16 %v234_v28, %v230_v27  ;;  %v233_v35 = vld [vmem:[#allocation2 + $0x360] sm:$0xff]  ;;  %v231_v36 = vld [vmem:[#allocation2 + $0x350] sm:$0xff]  ;;  %v2336_v37 = vpack.c.bf16 %v236_v30, %v232_v29  ;;  %v238_v39 = vld [vmem:[#allocation2 + $0x388] sm:$0xff] }
  0x81   :  { %2319 = vmatpush1.bf16.msra.mxu1 %v2318_v47  ;;  %2255 = vmatprep.subr.bf16.mxu0 %v2254_v48  ;;  %v235_v38 = vld [vmem:[#allocation2 + $0x370] sm:$0xff]  ;;  %v242_v40 = vld [vmem:[#allocation2 + $0x3a8] sm:$0xff]  ;;  %v240_v41 = vld [vmem:[#allocation2 + $0x398] sm:$0xff]  ;;  %v2272_v43 = vpack.c.bf16 %v233_v35, %v229_v34 }
  0x82   :  { %2321 = vmatprep.subr.bf16.mxu1 %v2320_v52  ;;  %v244_v42 = vld [vmem:[#allocation2 + $0x3b8] sm:$0xff]  ;;  %v2338_v44 = vpack.c.bf16 %v235_v38, %v231_v36  ;;  %v2274_v45 = vpack.c.bf16 %v242_v40, %v238_v39  ;;  %v237_v46 = vld [vmem:[#allocation2 + $0x380] sm:$0xff]  ;;  %v239_v48 = vld [vmem:[#allocation2 + $0x390] sm:$0xff] }
  0x83   :  { %v241_v47 = vld [vmem:[#allocation2 + $0x3a0] sm:$0xff]  ;;  %v2340_v49 = vpack.c.bf16 %v244_v42, %v240_v41  ;;  %v243_v50 = vld [vmem:[#allocation2 + $0x3b0] sm:$0xff]  ;;  %v246_v51 = vld [vmem:[#allocation2 + $0x3c8] sm:$0xff] }
  0x84   :  { %2257 = vmatpush1.bf16.msra.mxu0 %v2256_v58  ;;  %v250_v52 = vld [vmem:[#allocation2 + $0x3e8] sm:$0xf]  ;;  %v248_v53 = vld [vmem:[#allocation2 + $0x3d8] sm:$0xff]  ;;  %v2276_v55 = vpack.c.bf16 %v241_v47, %v237_v46  ;;  %v2342_v56 = vpack.c.bf16 %v243_v50, %v239_v48  ;;  %v245_v58 = vld [vmem:[#allocation2 + $0x3c0] sm:$0xff] }
  0x85   :  { %2323 = vmatpush1.bf16.msra.mxu1 %v2322_v59  ;;  %2259 = vmatprep.subr.bf16.mxu0 %v2258_v60  ;;  %v252_v54 = vld [vmem:[#allocation2 + $0x3f8] sm:$0xf]  ;;  %v2278_v57 = vpack.c.bf16 %v250_v52, %v246_v51  ;;  %v249_v59 = vld [vmem:[#allocation2 + $0x3e0] sm:$0xf]  ;;  %vm2780_vm3 = vmpackc.low %vm263_vm1, %vm2626_vm2 }
  0x86   :  { %2325 = vmatprep.subr.bf16.mxu1 %v2324_v0  ;;  %v2344_v61 = vpack.c.bf16 %v252_v54, %v248_v53  ;;  %v247_v62 = vld [vmem:[#allocation2 + $0x3d0] sm:$0xff]  ;;  %v2281_v0 = vpack.c.bf16 %v249_v59, %v245_v58  ;;  %v459_v2 = vld [vmem:[#allocation7 + $0x8] sm:$0x3f]  ;;  %v461_v3 = vld [vmem:[#allocation7 + $0x18] sm:$0x3f] }
  0x87   :  { %v251_v63 = vld [vmem:[#allocation2 + $0x3f0] sm:$0xf]  ;;  %v710_v4 = vld [vmem:[#allocation8 + $0x80] sm:$0xff]  ;;  %v711_v5 = vld [vmem:[#allocation8 + $0x88] sm:$0xff] }
  0x88   :  { %2261 = vmatpush1.bf16.msra.mxu0 %v2260_v6  ;;  %v2347_v1 = vpack.c.bf16 %v251_v63, %v247_v62  ;;  %v119_v6 = vld [vmem:[%s2984_s0] sm:$0xff]  ;;  %v2350_v11 = vpack.c.bf16 %v711_v5, %v710_v4  ;;  %v460_v12 = vld [vmem:[#allocation7 + $0x10] sm:$0x3f]  ;;  %v124_v15 = vld [vmem:[%s2984_s0 + $0x28] sm:$0xff] }
  0x89   :  { %2327 = vmatpush1.bf16.msra.mxu1 %v2326_v8  ;;  %2263 = vmatprep.subr.bf16.mxu0 %v2262_v9  ;;  %v742_v7 = vld [vmem:[#allocation8 + $0x180] sm:$0xff]  ;;  %v743_v8 = vld [vmem:[#allocation8 + $0x188] sm:$0xff]  ;;  %v122_v9 = vld [vmem:[%s2984_s0 + $0x18] sm:$0xff] }
  0x8a   :  { %2329 = vmatprep.subr.bf16.mxu1 %v2328_v13  ;;  %v458_v10 = vld [vmem:[#allocation7] sm:$0x3f]  ;;  %v2382_v13 = vpack.c.bf16 %v743_v8, %v742_v7  ;;  %v121_v14 = vld [vmem:[%s2984_s0 + $0x10] sm:$0xff]  ;;  %v695_v18 = vld [vmem:[#allocation8 + $0x8] sm:$0xff] }
  0x8b   :  { %v123_v16 = vld [vmem:[%s2984_s0 + $0x20] sm:$0xff]  ;;  %v456_v26 = vld [vmem:[%s2987_s3 + $0x10] sm:$0xff]  ;;  %v457_v27 = vld [vmem:[%s2987_s3 + $0x18] sm:$0xff] }
  0x8c   :  { %2265 = vmatpush1.bf16.msra.mxu0 %v2264_v19  ;;  %v694_v17 = vld [vmem:[#allocation8] sm:$0xff]  ;;  %v712_v28 = vld [vmem:[#allocation8 + $0x90] sm:$0xff]  ;;  %v713_v29 = vld [vmem:[#allocation8 + $0x98] sm:$0xff] }
  0x8d   :  { %2331 = vmatpush1.bf16.msra.mxu1 %v2330_v20  ;;  %2267 = vmatprep.subr.bf16.mxu0 %v2266_v21  ;;  %v726_v19 = vld [vmem:[#allocation8 + $0x100] sm:$0xff]  ;;  %v727_v20 = vld [vmem:[#allocation8 + $0x108] sm:$0xff]  ;;  %v2627_v21 = vmov 0.0   ;;  %v2352_v23 = vpack.c.bf16 %v695_v18, %v694_v17  ;;  %v744_v30 = vld [vmem:[#allocation8 + $0x190] sm:$0xff] }
  0x8e   :  { %2333 = vmatprep.subr.bf16.mxu1 %v2332_v25  ;;  %v454_v22 = vld [vmem:[%s2987_s3] sm:$0xff]  ;;  %v2384_v24 = vpack.c.bf16 %v727_v20, %v726_v19  ;;  %v455_v25 = vld [vmem:[%s2987_s3 + $0x8] sm:$0xff]  ;;  %v697_v34 = vld [vmem:[#allocation8 + $0x18] sm:$0xff] }
  0x8f   :  { %v729_v38 = vld [vmem:[#allocation8 + $0x118] sm:$0xff]  ;;  %v714_v40 = vld [vmem:[#allocation8 + $0xa0] sm:$0xff]  ;;  %v715_v41 = vld [vmem:[#allocation8 + $0xa8] sm:$0xff] }
  0x90   :  { %2269 = vmatpush1.bf16.msra.mxu0 %v2268_v31  ;;  %v2354_v31 = vpack.c.bf16 %v713_v29, %v712_v28  ;;  %v2358_v42 = vpack.c.bf16 %v715_v41, %v714_v40  ;;  %v699_v47 = vld [vmem:[#allocation8 + $0x28] sm:$0xff]  ;;  %v730_v48 = vld [vmem:[#allocation8 + $0x120] sm:$0xff]  ;;  %v716_v52 = vld [vmem:[#allocation8 + $0xb0] sm:$0xff] }
  0x91   :  { %2335 = vmatpush1.bf16.msra.mxu1 %v2334_v32  ;;  %2271 = vmatprep.subr.bf16.mxu0 %v2270_v33  ;;  %v745_v32 = vld [vmem:[#allocation8 + $0x198] sm:$0xff]  ;;  %v696_v33 = vld [vmem:[#allocation8 + $0x10] sm:$0xff]  ;;  %v731_v50 = vld [vmem:[#allocation8 + $0x128] sm:$0xff] }
  0x92   :  { %2337 = vmatprep.subr.bf16.mxu1 %v2336_v37  ;;  %v2386_v35 = vpack.c.bf16 %v745_v32, %v744_v30  ;;  %v2356_v36 = vpack.c.bf16 %v697_v34, %v696_v33  ;;  %v728_v37 = vld [vmem:[#allocation8 + $0x110] sm:$0xff]  ;;  %v2392_v51 = vpack.c.bf16 %v731_v50, %v730_v48  ;;  %v717_v53 = vld [vmem:[#allocation8 + $0xb8] sm:$0xff]  ;;  %v751_v4 = vld [vmem:[#allocation8 + $0x1c8] sm:$0xff] }
  0x93   :  { %v2388_v39 = vpack.c.bf16 %v729_v38, %v728_v37  ;;  %v2362_v54 = vpack.c.bf16 %v717_v53, %v716_v52  ;;  %v701_v59 = vld [vmem:[#allocation8 + $0x38] sm:$0xff]  ;;  %v732_v60 = vld [vmem:[#allocation8 + $0x130] sm:$0xff]  ;;  %v702_v5 = vld [vmem:[#allocation8 + $0x40] sm:$0xff] }
  0x94   :  { %2273 = vmatpush1.bf16.msra.mxu0 %v2272_v43  ;;  %v746_v43 = vld [vmem:[#allocation8 + $0x1a0] sm:$0xff]  ;;  %v733_v62 = vld [vmem:[#allocation8 + $0x138] sm:$0xff]  ;;  %v704_v17 = vld [vmem:[#allocation8 + $0x50] sm:$0xff] }
  0x95   :  { %2339 = vmatpush1.bf16.msra.mxu1 %v2338_v44  ;;  %2275 = vmatprep.subr.bf16.mxu0 %v2274_v45  ;;  %v747_v44 = vld [vmem:[#allocation8 + $0x1a8] sm:$0xff]  ;;  %v698_v45 = vld [vmem:[#allocation8 + $0x20] sm:$0xff]  ;;  %v2396_v63 = vpack.c.bf16 %v733_v62, %v732_v60  ;;  %v705_v18 = vld [vmem:[#allocation8 + $0x58] sm:$0xff] }
  0x96   :  { %2341 = vmatprep.subr.bf16.mxu1 %v2340_v49  ;;  %v2390_v46 = vpack.c.bf16 %v747_v44, %v746_v43  ;;  %v2360_v49 = vpack.c.bf16 %v699_v47, %v698_v45  ;;  %v2372_v20 = vpack.c.bf16 %v705_v18, %v704_v17  ;;  %v755_v29 = vld [vmem:[#allocation8 + $0x1e8] sm:$0xff]  ;;  %v706_v30 = vld [vmem:[#allocation8 + $0x60] sm:$0xff]  ;;  %v724_v37 = vld [vmem:[#allocation8 + $0xf0] sm:$0xff] }
  0x97   :  { %v738_v34 = vld [vmem:[#allocation8 + $0x160] sm:$0xff]  ;;  %v725_v38 = vld [vmem:[#allocation8 + $0xf8] sm:$0xff]  ;;  %v108_v60 = vld [vmem:[#allocation5 + $0x8] sm:$0xff] }
  0x98   :  { %2277 = vmatpush1.bf16.msra.mxu0 %v2276_v55  ;;  %v748_v55 = vld [vmem:[#allocation8 + $0x1b0] sm:$0xff]  ;;  %v2378_v40 = vpack.c.bf16 %v725_v38, %v724_v37  ;;  %v757_v41 = vld [vmem:[#allocation8 + $0x1f8] sm:$0xff] }
  0x99   :  { %2343 = vmatpush1.bf16.msra.mxu1 %v2342_v56  ;;  %2280 = vmatprep.subr.msk.bf16.mxu0 %vm2780_vm3, %v2278_v57  ;;  %v749_v56 = vld [vmem:[#allocation8 + $0x1b8] sm:$0xff]  ;;  %v700_v57 = vld [vmem:[#allocation8 + $0x30] sm:$0xff] }
  0x9a   :  { %2346 = vmatprep.subr.msk.bf16.mxu1 %vm2780_vm3, %v2344_v61  ;;  %v2394_v58 = vpack.c.bf16 %v749_v56, %v748_v55  ;;  %v2364_v61 = vpack.c.bf16 %v701_v59, %v700_v57  ;;  %v709_v43 = vld [vmem:[#allocation8 + $0x78] sm:$0xff]  ;;  %v107_v57 = vld [vmem:[#allocation5] sm:$0xff]  ;;  %v109_v59 = vld [vmem:[#allocation5 + $0x10] sm:$0xff] }
  0x9b   :  { %v741_v47 = vld [vmem:[#allocation8 + $0x178] sm:$0xff] }
  0x9c   :  { %2283 = vmatpush1.bf16.msk.msra.mxu0 %vm2780_vm3, %v2281_v0  ;;  %v718_v0 = vld [vmem:[#allocation8 + $0xc0] sm:$0xff] }
  0x9d   :  { %2349 = vmatpush1.bf16.msk.msra.mxu1 %vm2780_vm3, %v2347_v1  ;;  %2114 = vmatprep.subr.msk.mxu0 %vm475_vm4, %v459_v2  ;;  %v719_v1 = vld [vmem:[#allocation8 + $0xc8] sm:$0xff]  ;;  %v750_v2 = vld [vmem:[#allocation8 + $0x1c0] sm:$0xff] }
  0x9e   :  { %2120 = vmatprep.subr.msk.mxu1 %vm475_vm4, %v461_v3  ;;  %v2366_v3 = vpack.c.bf16 %v719_v1, %v718_v0  ;;  %v2398_v7 = vpack.c.bf16 %v751_v4, %v750_v2  ;;  %v111_v4 = vld [vmem:[#allocation5 + $0x20] sm:$0xff] }
  0x9f   :  { %341 = vmatmul.mubr.f32.vlgmr.msra.gmra.mrb[0].mxu0 %v119_v6 }
  0xa0   :  { %424 = vmatmul.mubr.f32.vlgmr.msra.gmra.mrb[0].mxu1 %v119_v6  ;;  %2107 = vmatprep.mubr.msk.f32.mxu0 %vm253_vm0, %v122_v9  ;;  %v703_v6 = vld [vmem:[#allocation8 + $0x48] sm:$0xff] }
  0xa1   :  { %2112 = vmatprep.mubr.msk.f32.mxu1 %vm253_vm0, %v122_v9  ;;  %2115 = vmatpush1.msk.msra.mxu0 %vm475_vm4, %v458_v10  ;;  %v2368_v8 = vpack.c.bf16 %v703_v6, %v702_v5  ;;  %v734_v9 = vld [vmem:[#allocation8 + $0x140] sm:$0xff]  ;;  %v735_v10 = vld [vmem:[#allocation8 + $0x148] sm:$0xff] }
  0xa2   :  { %2121 = vmatpush1.msk.msra.mxu1 %vm475_vm4, %v460_v12  ;;  %2351 = vmatprep.subr.bf16.mxu0 %v2350_v11  ;;  %v2400_v11 = vpack.c.bf16 %v735_v10, %v734_v9  ;;  %v720_v12 = vld [vmem:[#allocation8 + $0xd0] sm:$0xff] }
  0xa3   :  { %347 = vmatmul.mubr.f32.gmra.mrb[2].mxu0 %v121_v14  ;;  %2383 = vmatprep.subr.bf16.mxu1 %v2382_v13  ;;  %v721_v13 = vld [vmem:[#allocation8 + $0xd8] sm:$0xff] }
  0xa4   :  { %430 = vmatmul.mubr.f32.gmra.mrb[2].mxu1 %v121_v14  ;;  %2108 = vmatprep.mubr.msk.f32.mxu0 %vm253_vm0, %v124_v15  ;;  %v752_v14 = vld [vmem:[#allocation8 + $0x1d0] sm:$0xff] }
  0xa5   :  { %2113 = vmatprep.mubr.msk.f32.mxu1 %vm253_vm0, %v124_v15  ;;  %v2370_v15 = vpack.c.bf16 %v721_v13, %v720_v12  ;;  %v114_v12 = vld [vmem:[#allocation5 + $0x38] sm:$0xff] }
  0xa7   :  { %353 = vmatmul.mubr.f32.gmra.mrb[4].mxu0 %v123_v16 }
  0xa8   :  { %436 = vmatmul.mubr.f32.gmra.mrb[4].mxu1 %v123_v16  ;;  %552 = vmatprep.mubr.f32.mxu0 %v2627_v21  ;;  %v753_v16 = vld [vmem:[#allocation8 + $0x1d8] sm:$0xff] }
  0xa9   :  { %641 = vmatprep.mubr.f32.mxu1 %v2627_v21  ;;  %v2402_v19 = vpack.c.bf16 %v753_v16, %v752_v14 }
  0xab   :  { %2116 = vmatmul.mubr.msk.f32.vlgmr.msra.gmra.mrb[6].mxu0 %vm462_vm5, %v454_v22 }
  0xac   :  { %2122 = vmatmul.mubr.msk.f32.vlgmr.msra.gmra.mrb[6].mxu1 %vm462_vm5, %v454_v22  ;;  %558 = vmatprep.mubr.f32.mxu0 %v2627_v21  ;;  %v736_v22 = vld [vmem:[#allocation8 + $0x150] sm:$0xff] }
  0xad   :  { %647 = vmatprep.mubr.f32.mxu1 %v2627_v21  ;;  %2353 = vmatpush3.bf16.msra.mxu0 %v2352_v23  ;;  %v737_v23 = vld [vmem:[#allocation8 + $0x158] sm:$0xff] }
  0xae   :  { %2385 = vmatpush3.bf16.msra.mxu1 %v2384_v24  ;;  %2355 = vmatprep.subr.bf16.mxu0 %v2354_v31  ;;  %v2404_v24 = vpack.c.bf16 %v737_v23, %v736_v22  ;;  %v707_v31 = vld [vmem:[#allocation8 + $0x68] sm:$0xff] }
  0xaf   :  { %2117 = vmatmul.mubr.msk.f32.gmra.mrb[8].mxu0 %vm462_vm5, %v455_v25  ;;  %2387 = vmatprep.subr.bf16.mxu1 %v2386_v35  ;;  %v2376_v33 = vpack.c.bf16 %v707_v31, %v706_v30  ;;  %v739_v35 = vld [vmem:[#allocation8 + $0x168] sm:$0xff] }
  0xb0   :  { %2123 = vmatmul.mubr.msk.f32.gmra.mrb[8].mxu1 %vm462_vm5, %v455_v25  ;;  %564 = vmatprep.mubr.f32.mxu0 %v2627_v21  ;;  %v722_v25 = vld [vmem:[#allocation8 + $0xe0] sm:$0xff] }
  0xb1   :  { %653 = vmatprep.mubr.f32.mxu1 %v2627_v21  ;;  %2357 = vmatpush3.bf16.msra.mxu0 %v2356_v36  ;;  %v2408_v36 = vpack.c.bf16 %v739_v35, %v738_v34 }
  0xb2   :  { %2389 = vmatpush3.bf16.msra.mxu1 %v2388_v39  ;;  %2359 = vmatprep.subr.bf16.mxu0 %v2358_v42  ;;  %v756_v39 = vld [vmem:[#allocation8 + $0x1f0] sm:$0xff] }
  0xb3   :  { %2118 = vmatmul.mubr.msk.f32.gmra.mrb[10].mxu0 %vm462_vm5, %v456_v26  ;;  %2391 = vmatprep.subr.bf16.mxu1 %v2390_v46  ;;  %v708_v42 = vld [vmem:[#allocation8 + $0x70] sm:$0xff]  ;;  %v2410_v44 = vpack.c.bf16 %v757_v41, %v756_v39 }
  0xb4   :  { %2124 = vmatmul.mubr.msk.f32.gmra.mrb[10].mxu1 %vm462_vm5, %v456_v26  ;;  %570 = vmatprep.mubr.f32.mxu0 %v2627_v21  ;;  %v723_v26 = vld [vmem:[#allocation8 + $0xe8] sm:$0xff]  ;;  %v2380_v45 = vpack.c.bf16 %v709_v43, %v708_v42  ;;  %v740_v46 = vld [vmem:[#allocation8 + $0x170] sm:$0xff] }
  0xb5   :  { %659 = vmatprep.mubr.f32.mxu1 %v2627_v21  ;;  %2361 = vmatpush3.bf16.msra.mxu0 %v2360_v49  ;;  %v2374_v28 = vpack.c.bf16 %v723_v26, %v722_v25  ;;  %v2412_v48 = vpack.c.bf16 %v741_v47, %v740_v46  ;;  %v116_v25 = vld [vmem:[#allocation5 + $0x48] sm:$0xff] }
  0xb6   :  { %2393 = vmatpush3.bf16.msra.mxu1 %v2392_v51  ;;  %2363 = vmatprep.subr.bf16.mxu0 %v2362_v54 }
  0xb7   :  { %2119 = vmatmul.mubr.msk.f32.gmra.mrb[12].mxu0 %vm462_vm5, %v457_v27  ;;  %2395 = vmatprep.subr.bf16.mxu1 %v2394_v58 }
  0xb8   :  { %2125 = vmatmul.mubr.msk.f32.gmra.mrb[12].mxu1 %vm462_vm5, %v457_v27  ;;  %v754_v27 = vld [vmem:[#allocation8 + $0x1e0] sm:$0xff] }
  0xb9   :  { %2365 = vmatpush3.bf16.msra.mxu0 %v2364_v61  ;;  %v2406_v32 = vpack.c.bf16 %v755_v29, %v754_v27  ;;  %v118_v29 = vld [vmem:[#allocation5 + $0x58] sm:$0xff] }
  0xba   :  { %2397 = vmatpush3.bf16.msra.mxu1 %v2396_v63  ;;  %2367 = vmatprep.subr.bf16.mxu0 %v2366_v3  ;;  %v110_v63 = vld [vmem:[#allocation5 + $0x18] sm:$0xff] }
  0xbb   :  { %2399 = vmatprep.subr.bf16.mxu1 %v2398_v7  ;;  %v113_v7 = vld [vmem:[#allocation5 + $0x30] sm:$0xff] }
  0xbd   :  { %2369 = vmatpush3.bf16.msra.mxu0 %v2368_v8  ;;  %v112_v8 = vld [vmem:[#allocation5 + $0x28] sm:$0xff] }
  0xbe   :  { %2401 = vmatpush3.bf16.msra.mxu1 %v2400_v11  ;;  %2371 = vmatprep.subr.bf16.mxu0 %v2370_v15 }
  0xbf   :  { %2403 = vmatprep.subr.bf16.mxu1 %v2402_v19 }
  0xc1   :  { %2373 = vmatpush3.bf16.msra.mxu0 %v2372_v20  ;;  %v115_v20 = vld [vmem:[#allocation5 + $0x40] sm:$0xff] }
  0xc2   :  { %2405 = vmatpush3.bf16.msra.mxu1 %v2404_v24  ;;  %2375 = vmatprep.subr.bf16.mxu0 %v2374_v28  ;;  %v117_v24 = vld [vmem:[#allocation5 + $0x50] sm:$0xff] }
  0xc3   :  { %2407 = vmatprep.subr.bf16.mxu1 %v2406_v32 }
  0xc5   :  { %2377 = vmatpush3.bf16.msra.mxu0 %v2376_v33 }
  0xc6   :  { %2409 = vmatpush3.bf16.msra.mxu1 %v2408_v36  ;;  %2379 = vmatprep.subr.bf16.mxu0 %v2378_v40 }
  0xc7   :  { %2411 = vmatprep.subr.bf16.mxu1 %v2410_v44 }
  0xc9   :  { %2381 = vmatpush3.bf16.msra.mxu0 %v2380_v45 }
  0xca   :  { %2413 = vmatpush3.bf16.msra.mxu1 %v2412_v48 }
 0x172   :  { %v342_v49 = vpop.f32.mrb[0].mxu0 }
 0x173   :  { %v425_v50 = vpop.f32.mrb[0].mxu1  ;;  %v344_v51 = vpop.f32.mrb[1].mxu0  ;;  %v442_v1 = vadd.f32 %v342_v49, %v107_v57 }
 0x174   :  { %v427_v52 = vpop.f32.mrb[1].mxu1  ;;  %v444_v2 = vadd.f32 %v425_v50, %v109_v59  ;;  %v443_v3 = vadd.f32 %v344_v51, %v108_v60 }
 0x175   :  { %v445_v6 = vadd.f32 %v427_v52, %v110_v63  ;;  %v996_v63 = vld [vmem:[#allocation10 + $0x8] sm:$0xff] }
 0x176   :  { %v348_v53 = vpop.f32.mrb[2].mxu0  ;;  %1022 = vmatprep.subr.mxu1 %v996_v63 }
 0x177   :  { %v431_v54 = vpop.f32.mrb[2].mxu1  ;;  %v350_v55 = vpop.f32.mrb[3].mxu0  ;;  %v446_v16 = vadd.f32 %v348_v53, %v111_v4  ;;  %v1004_v4 = vld [vmem:[#allocation10 + $0x48] sm:$0xff] }
 0x178   :  { %v433_v56 = vpop.f32.mrb[3].mxu1  ;;  %v448_v18 = vadd.f32 %v431_v54, %v113_v7  ;;  %v447_v19 = vadd.f32 %v350_v55, %v112_v8  ;;  %v1007_v7 = vld [vmem:[#allocation10 + $0x60] sm:$0xff]  ;;  %v1012_v8 = vld [vmem:[#allocation10 + $0x88] sm:$0xff] }
 0x179   :  { %v449_v23 = vadd.f32 %v433_v56, %v114_v12 }
 0x17a   :  { %v354_v58 = vpop.f32.mrb[4].mxu0 }
 0x17b   :  { %v437_v61 = vpop.f32.mrb[4].mxu1  ;;  %v356_v62 = vpop.f32.mrb[5].mxu0  ;;  %v450_v33 = vadd.f32 %v354_v58, %v115_v20  ;;  %v998_v20 = vld [vmem:[#allocation10 + $0x18] sm:$0xff] }
 0x17c   :  { %v439_v0 = vpop.f32.mrb[5].mxu1  ;;  %v452_v36 = vadd.f32 %v437_v61, %v117_v24  ;;  %v451_v37 = vadd.f32 %v356_v62, %v116_v25  ;;  %v898_v62 = vld [vmem:[%s2990_s6] sm:$0xff]  ;;  %v1001_v24 = vld [vmem:[#allocation10 + $0x30] sm:$0xff]  ;;  %v1006_v25 = vld [vmem:[#allocation10 + $0x58] sm:$0xff] }
 0x17d   :  { %v453_v41 = vadd.f32 %v439_v0, %v118_v29  ;;  %v995_v0 = vld [vmem:[#allocation10] sm:$0xff]  ;;  %v1014_v29 = vld [vmem:[#allocation10 + $0x98] sm:$0xff] }
 0x17e   :  { %v554_v5 = vpop.f32.mrb[6].mxu0 }
 0x17f   :  { %v666_v9 = vmul.f32 %v554_v5, %v442_v1  ;;  %v643_v10 = vpop.f32.mrb[6].mxu1  ;;  %v556_v11 = vpop.f32.mrb[7].mxu0  ;;  %v2851_v1 = vld [vmem:[%s2992_s8] sm:$0x1] }
 0x180   :  { %v668_v13 = vmul.f32 %v643_v10, %v444_v2  ;;  %v667_v14 = vmul.f32 %v556_v11, %v443_v3  ;;  %v645_v15 = vpop.f32.mrb[7].mxu1  ;;  %v1000_v2 = vld [vmem:[#allocation10 + $0x28] sm:$0xff]  ;;  %v999_v3 = vld [vmem:[#allocation10 + $0x20] sm:$0xff] }
 0x181   :  { %v669_v17 = vmul.f32 %v645_v15, %v445_v6  ;;  %v1003_v5 = vld [vmem:[#allocation10 + $0x40] sm:$0xff]  ;;  %v1008_v6 = vld [vmem:[#allocation10 + $0x68] sm:$0xff] }
 0x182   :  { %v560_v22 = vpop.f32.mrb[8].mxu0  ;;  %v1016_v10 = vld [vmem:[#allocation10 + $0xa8] sm:$0xff]  ;;  %v1015_v11 = vld [vmem:[#allocation10 + $0xa0] sm:$0xff] }
 0x183   :  { %v670_v26 = vmul.f32 %v560_v22, %v446_v16  ;;  %v649_v27 = vpop.f32.mrb[8].mxu1  ;;  %v562_v28 = vpop.f32.mrb[9].mxu0  ;;  %v997_v22 = vld [vmem:[#allocation10 + $0x10] sm:$0xff] }
 0x184   :  { %v672_v30 = vmul.f32 %v649_v27, %v448_v18  ;;  %v671_v31 = vmul.f32 %v562_v28, %v447_v19  ;;  %v651_v32 = vpop.f32.mrb[9].mxu1  ;;  %v899_v19 = vld [vmem:[%s2990_s6 + $0x8] sm:$0xff]  ;;  %v1010_v27 = vld [vmem:[#allocation10 + $0x78] sm:$0xff]  ;;  %v1009_v28 = vld [vmem:[#allocation10 + $0x70] sm:$0xff]  ;;  %s2628_s6 = smov [#allocation11]  }
 0x185   :  { %v674_v34 = vadd.f32 %v670_v26, %v666_v9  ;;  %v673_v35 = vmul.f32 %v651_v32, %v449_v23  ;;  %v1011_v9 = vld [vmem:[#allocation10 + $0x80] sm:$0xff]  ;;  %v1002_v23 = vld [vmem:[#allocation10 + $0x38] sm:$0xff]  ;;  %v1005_v26 = vld [vmem:[#allocation10 + $0x50] sm:$0xff]  ;;  %s2066_s17 = sshll.u32 %s2628_s6, 4  ;;  %s2067_s17 = int_to_ptr.vmem [resolvable:$true] %s2066_s17 }
 0x186   :  { %v676_v38 = vadd.f32 %v672_v30, %v668_v13  ;;  %v675_v39 = vadd.f32 %v671_v31, %v667_v14  ;;  %v566_v40 = vpop.f32.mrb[10].mxu0  ;;  %v1013_v30 = vld [vmem:[#allocation10 + $0x90] sm:$0xff]  ;;  %v1018_v31 = vld [vmem:[#allocation10 + $0xb8] sm:$0xff]  ;;  %s2541_s18 = scalar_lea.vmem %s2067_s17, 512  ;;  %p2546_p13 = scmp.lt.s32.totalorder %s2067_s17, %s2067_s17 }
 0x187   :  { %v677_v42 = vadd.f32 %v673_v35, %v669_v17  ;;  %v678_v43 = vmul.f32 %v566_v40, %v450_v33  ;;  %v655_v44 = vpop.f32.mrb[10].mxu1  ;;  %v568_v45 = vpop.f32.mrb[11].mxu0  ;;  %v1017_v32 = vld [vmem:[#allocation10 + $0xb0] sm:$0xff]  ;;  %p2542_p12 = scmp.ne.s32.totalorder %s2067_s17, %s2541_s18  ;;  %p2547_p0 = scmp.lt.s32.totalorder %s2541_s18, %s2541_s18 }
 0x188   :  { %v680_v46 = vmul.f32 %v655_v44, %v452_v36  ;;  %v679_v47 = vmul.f32 %v568_v45, %v451_v37  ;;  %v657_v48 = vpop.f32.mrb[11].mxu1 }
 0x189   :  { %v681_v49 = vmul.f32 %v657_v48, %v453_v41  ;;  %v682_v50 = vadd.f32 %v678_v43, %v674_v34  ;;  %p2548_p1 = por %p2547_p0, %p2546_p13 }
 0x18a   :  { %v572_v51 = vpop.f32.mrb[12].mxu0  ;;  %v684_v52 = vadd.f32 %v680_v46, %v676_v38  ;;  %v683_v53 = vadd.f32 %v679_v47, %v675_v39 }
 0x18b   :  { %v686_v54 = vadd.f32 %v682_v50, %v572_v51  ;;  %v661_v55 = vpop.f32.mrb[12].mxu1  ;;  %v574_v56 = vpop.f32.mrb[13].mxu0  ;;  %v685_v57 = vadd.f32 %v681_v49, %v677_v42  ;;  %p2549_p2 = pnand %p2548_p1, %p2542_p12 }
 0x18c   :  { %v688_v58 = vadd.f32 %v684_v52, %v661_v55  ;;  %v687_v59 = vadd.f32 %v683_v53, %v574_v56  ;;  %v663_v60 = vpop.f32.mrb[13].mxu1 }
 0x18d   :  { %690 = vst [vmem:[#allocation11] sm:$0xff] %v686_v54  ;;  %v689_v61 = vadd.f32 %v685_v57, %v663_v60 }
 0x18e   :  { %692 = vst [vmem:[#allocation11 + $0x10] sm:$0xff] %v688_v58  ;;  %691 = vst [vmem:[#allocation11 + $0x8] sm:$0xff] %v687_v59  ;;  %822 = vmatprep.mubr.f32.mxu0 %v687_v59 }
 0x18f   :  { %693 = vst [vmem:[#allocation11 + $0x18] sm:$0xff] %v689_v61  ;;  %892 = vmatprep.mubr.f32.mxu1 %v689_v61  ;;  %823 = vmatmul.mubr.f32.vlgmr.msra.gmra.mrb[14].mxu0 %v686_v54 }
 0x190   :  { %893 = vmatmul.mubr.f32.vlgmr.msra.gmra.mrb[14].mxu1 %v688_v58  ;;  %2215 = vmatprep.mubr.msk.f32.mxu0 %vm902_vm6, %v898_v62 }
 0x191   :  { %1086 = vmatprep.mubr.f32.mxu1 %v2627_v21  ;;  %1023 = vmatpush1.msra.mxu1 %v995_v0 }
 0x192   :  { %1164 = vmatprep.subr.mxu1 %v1000_v2 }
 0x194   :  { %2128 = vmatmul.mubr.msk.f32.vlgmr.msra.gmra.mrb[16].mxu1 %vm902_vm6, %v2851_v1 }
 0x195   :  { %1228 = vmatprep.mubr.f32.mxu1 %v2627_v21  ;;  %1165 = vmatpush1.msra.mxu1 %v999_v3 }
 0x196   :  { %1306 = vmatprep.subr.mxu1 %v1004_v4 }
 0x198   :  { %2130 = vmatmul.mubr.msk.f32.vlgmr.msra.gmra.mrb[18].mxu1 %vm902_vm6, %v2851_v1 }
 0x199   :  { %1370 = vmatprep.mubr.f32.mxu1 %v2627_v21  ;;  %1307 = vmatpush1.msra.mxu1 %v1003_v5 }
 0x19a   :  { %1448 = vmatprep.subr.mxu1 %v1008_v6 }
 0x19c   :  { %2132 = vmatmul.mubr.msk.f32.vlgmr.msra.gmra.mrb[20].mxu1 %vm902_vm6, %v2851_v1 }
 0x19d   :  { %1512 = vmatprep.mubr.f32.mxu1 %v2627_v21  ;;  %1449 = vmatpush1.msra.mxu1 %v1007_v7 }
 0x19e   :  { %1590 = vmatprep.subr.mxu1 %v1012_v8 }
 0x1a0   :  { %2134 = vmatmul.mubr.msk.f32.vlgmr.msra.gmra.mrb[22].mxu1 %vm902_vm6, %v2851_v1 }
 0x1a1   :  { %1654 = vmatprep.mubr.f32.mxu1 %v2627_v21  ;;  %1591 = vmatpush1.msra.mxu1 %v1011_v9 }
 0x1a2   :  { %1732 = vmatprep.subr.mxu1 %v1016_v10 }
 0x1a4   :  { %2136 = vmatmul.mubr.msk.f32.vlgmr.msra.gmra.mrb[24].mxu1 %vm902_vm6, %v2851_v1 }
 0x1a5   :  { %1796 = vmatprep.mubr.f32.mxu1 %v2627_v21  ;;  %1733 = vmatpush1.msra.mxu1 %v1015_v11 }
 0x1a8   :  { %2138 = vmatmul.mubr.msk.f32.vlgmr.msra.gmra.mrb[26].mxu1 %vm902_vm6, %v2851_v1 }
 0x262   :  { %v2172_v12 = vpop.f32.mrb[14].mxu0 }
 0x263   :  { %v2207_v13 = vpop.f32.mrb[14].mxu1  ;;  %v2173_v14 = vpop.f32.mrb[15].mxu0 }
 0x264   :  { %v2174_v15 = vadd.f32 %v2173_v14, %v2172_v12  ;;  %v2208_v16 = vpop.f32.mrb[15].mxu1 }
 0x265   :  { %v2209_v17 = vadd.f32 %v2208_v16, %v2207_v13 }
 0x267   :  { %v895_v18 = vadd.f32 %v2209_v17, %v2174_v15  ;;  %v1088_v33 = vpop.f32.mrb[16].mxu1 }
 0x268   :  { %v1090_v34 = vpop.f32.mrb[17].mxu1 }
 0x269   :  { %2213 = vmatprep.subr.mxu0 %v895_v18  ;;  %v1898_v35 = vcombine.low %v1088_v33, %v1090_v34 }
 0x26a   :  { %2214 = vmatpush3.msra.mxu0 %v895_v18 }
 0x26b   :  { %2216 = vmatmul.mubr.msk.f32.vlgmr.msra.gmra.mrb[16].mxu0 %vm902_vm6, %v899_v19  ;;  %1093 = vmatprep.subr.mxu0 %v998_v20  ;;  %v1230_v36 = vpop.f32.mrb[18].mxu1 }
 0x26c   :  { %1094 = vmatpush1.msra.mxu0 %v997_v22  ;;  %1157 = vmatprep.mubr.f32.mxu0 %v2627_v21  ;;  %v1232_v37 = vpop.f32.mrb[19].mxu1 }
 0x26d   :  { %1235 = vmatprep.subr.mxu0 %v1002_v23  ;;  %v1900_v38 = vcombine.low %v1230_v36, %v1232_v37 }
 0x26f   :  { %2129 = vmatmul.mubr.msk.f32.vlgmr.msra.gmra.mrb[18].mxu0 %vm902_vm6, %v2851_v1  ;;  %v1372_v39 = vpop.f32.mrb[20].mxu1 }
 0x270   :  { %1236 = vmatpush1.msra.mxu0 %v1001_v24  ;;  %1299 = vmatprep.mubr.f32.mxu0 %v2627_v21  ;;  %v1374_v40 = vpop.f32.mrb[21].mxu1 }
 0x271   :  { %1377 = vmatprep.subr.mxu0 %v1006_v25  ;;  %v1947_v41 = vcombine.low %v1372_v39, %v1374_v40 }
 0x273   :  { %2131 = vmatmul.mubr.msk.f32.vlgmr.msra.gmra.mrb[20].mxu0 %vm902_vm6, %v2851_v1  ;;  %v2892_v42 = vpop.f32.mrb[22].mxu1 }
 0x274   :  { %1378 = vmatpush1.msra.mxu0 %v1005_v26  ;;  %1441 = vmatprep.mubr.f32.mxu0 %v2627_v21  ;;  %v1516_v43 = vpop.f32.mrb[23].mxu1 }
 0x275   :  { %1519 = vmatprep.subr.mxu0 %v1010_v27  ;;  %v1949_v44 = vcombine.low %v2892_v42, %v1516_v43 }
 0x277   :  { %2133 = vmatmul.mubr.msk.f32.vlgmr.msra.gmra.mrb[22].mxu0 %vm902_vm6, %v2851_v1  ;;  %v2895_v45 = vpop.f32.mrb[24].mxu1 }
 0x278   :  { %1520 = vmatpush1.msra.mxu0 %v1009_v28  ;;  %1583 = vmatprep.mubr.f32.mxu0 %v2627_v21 }
 0x279   :  { %1661 = vmatprep.subr.mxu0 %v1014_v29 }
 0x27b   :  { %2135 = vmatmul.mubr.msk.f32.vlgmr.msra.gmra.mrb[24].mxu0 %vm902_vm6, %v2851_v1 }
 0x27c   :  { %1662 = vmatpush1.msra.mxu0 %v1013_v30  ;;  %1725 = vmatprep.mubr.f32.mxu0 %v2627_v21 }
 0x27d   :  { %1803 = vmatprep.subr.mxu0 %v1018_v31 }
 0x27f   :  { %2137 = vmatmul.mubr.msk.f32.vlgmr.msra.gmra.mrb[26].mxu0 %vm902_vm6, %v2851_v1 }
 0x280   :  { %1804 = vmatpush1.msra.mxu0 %v1017_v32  ;;  %1867 = vmatprep.mubr.f32.mxu0 %v2627_v21  ;;  %v2897_v21 = vpop.f32.mrb[25].mxu1 }
 0x281   :  { %v1996_v46 = vcombine.low %v2895_v45, %v2897_v21  ;;  %v2901_v47 = vpop.f32.mrb[26].mxu1 }
 0x282   :  { %v2903_v48 = vpop.f32.mrb[27].mxu1 }
 0x283   :  { %2139 = vmatmul.mubr.msk.f32.vlgmr.msra.gmra.mrb[28].mxu0 %vm902_vm6, %v2851_v1  ;;  %v1998_v49 = vcombine.low %v2901_v47, %v2903_v48 }
 0x284   :  { %2552 = shalt.err (!%p2549_p2)
}
 0x285   :  { %s2553_s25 = scalar_lea.hbm %s2995_s11, 512 }
 0x286   :  { %p2554_p3 = scmp.ne.s32.totalorder %s2995_s11, %s2553_s25  ;;  %p2557_p4 = scmp.lt.u32.totalorder %s2553_s25, %s2995_s11 }
 0x288   :  { %p2559_p5 = pnand %p2557_p4, %p2554_p3 }
 0x28a   :  { %2562 = shalt.err (!%p2559_p5)
}
 0x28b   :  { %2069 = dma.vmem_to_hbm [thread:$0]  %s2067_s17, 512, %s2995_s11, [#allocation4]   ;;  %v2629_v50 = vmov 1966171168   ;;  %v1905_v52 = vlaneseq  ;;  %v901_v53 = vld [vmem:[%s2991_s7 + $0x8] sm:$0xff]  ;;  %v900_v11 = vld [vmem:[%s2991_s7] sm:$0xff] }
 0x28c   :  { %v1903_v51 = vunpack.c.l.s4 %v2629_v50  ;;  %v991_v22 = vld [vmem:[%s2993_s9] sm:$0xff]  ;;  %s2630_s7 = smov [#allocation12]  }
 0x28d   :  { %v1906_v55 = vshrl.u32 %v1905_v52, 7  ;;  %s2076_s5 = sshll.u32 %s2630_s7, 4  ;;  %s2077_s5 = int_to_ptr.vmem [resolvable:$true] %s2076_s5 }
 0x28e   :  { %v1904_v54 = vunpack.c.0.s8 %v1903_v51  ;;  %s2563_s3 = scalar_lea.vmem %s2077_s5, 128  ;;  %p2568_p7 = scmp.lt.s32.totalorder %s2077_s5, %s2077_s5 }
 0x28f   :  { %p2564_p6 = scmp.ne.s32.totalorder %s2077_s5, %s2563_s3  ;;  %p2569_p8 = scmp.lt.s32.totalorder %s2563_s3, %s2563_s3 }
 0x290   :  { %v2922_v59 = vsub.s32 %v1904_v54, %v1906_v55 }
 0x291   :  { %p2570_p9 = por %p2569_p8, %p2568_p7 }
 0x292   :  { %v1908_v62 = vrot.slane %v1898_v35, %v2922_v59  ;;  %v1922_v4 = vrot.slane %v1900_v38, %v2922_v59  ;;  %v1957_v13 = vrot.slane %v1947_v41, %v2922_v59  ;;  %v1971_v23 = vrot.slane %v1949_v44, %v2922_v59  ;;  %v992_v44 = vld [vmem:[%s2993_s9 + $0x8] sm:$0xff] }
 0x293   :  { %v2006_v33 = vrot.slane %v1996_v46, %v2922_v59  ;;  %p2571_p10 = pnand %p2570_p9, %p2564_p6 }
 0x33e   :  { %v2217_v56 = vpop.f32.mrb[16].mxu0 }
 0x33f   :  { %v981_v57 = vadd.f32 %v2217_v56, %v901_v53  ;;  %v975_v58 = vpop.f32.mrb[17].mxu0 }
 0x340   :  { %v976_v20 = vadd.f32 %v975_v58, %v900_v11 }
 0x341   :  { %2429 = vrcp.f32 %v981_v57 }
 0x342   :  { %v1159_v60 = vpop.f32.mrb[18].mxu0 }
 0x343   :  { %v1161_v61 = vpop.f32.mrb[19].mxu0 }
 0x344   :  { %v1899_v63 = vcombine.low %v1159_v60, %v1161_v61 }
 0x346   :  { %v1915_v0 = vrot.slane %v1899_v63, %v2922_v59  ;;  %v1301_v1 = vpop.f32.mrb[20].mxu0 }
 0x347   :  { %v1303_v2 = vpop.f32.mrb[21].mxu0 }
 0x348   :  { %v1930_v3 = vcombine.low %v1908_v62, %v1915_v0  ;;  %v1901_v5 = vcombine.low %v1301_v1, %v1303_v2 }
 0x34a   :  { %v1929_v6 = vrot.slane %v1901_v5, %v2922_v59  ;;  %v1443_v7 = vpop.f32.mrb[22].mxu0  ;;  %v1938_v16 = vrot.slane %v1930_v3, %v2922_v59 }
 0x34b   :  { %v2430_v8 = vpop.eup %2429  ;;  %v1445_v9 = vpop.f32.mrb[23].mxu0 }
 0x34c   :  { %v985_v10 = vmul.f32 %v2430_v8, %v981_v57  ;;  %v1931_v12 = vcombine.low %v1922_v4, %v1929_v6  ;;  %v1948_v14 = vcombine.low %v1443_v7, %v1445_v9 }
 0x34e   :  { %v986_v15 = vsub.f32 2.0, %v985_v10  ;;  %v1945_v17 = vrot.slane %v1931_v12, %v2922_v59  ;;  %v1964_v18 = vrot.slane %v1948_v14, %v2922_v59  ;;  %v1585_v19 = vpop.f32.mrb[24].mxu0 }
 0x34f   :  { %v1587_v24 = vpop.f32.mrb[25].mxu0 }
 0x350   :  { %v987_v25 = vmul.f32 %v2430_v8, %v986_v15  ;;  %v1946_v26 = vcombine.low %v1938_v16, %v1945_v17  ;;  %v1979_v27 = vcombine.low %v1957_v13, %v1964_v18  ;;  %v1950_v28 = vcombine.low %v1585_v19, %v1587_v24 }
 0x352   :  { %v988_v29 = vmul.f32 %v987_v25, %v976_v20  ;;  %v2048_v30 = vadd.f32 %v1946_v26, %v991_v22  ;;  %v1978_v31 = vrot.slane %v1950_v28, %v2922_v59  ;;  %v1727_v32 = vpop.f32.mrb[26].mxu0  ;;  %v1987_v39 = vrot.slane %v1979_v27, %v2922_v59 }
 0x353   :  { %v1729_v34 = vpop.f32.mrb[27].mxu0 }
 0x354   :  { %v989_v35 = vadd.f32 15.5, %v988_v29  ;;  %v1980_v36 = vcombine.low %v1971_v23, %v1978_v31  ;;  %v1997_v37 = vcombine.low %v1727_v32, %v1729_v34  ;;  %v2051_v38 = vmax.f32 %v2048_v30, 0.0 }
 0x356   :  { %990 = vst [vmem:[#allocation12] sm:$0xff] %v989_v35  ;;  %v1994_v40 = vrot.slane %v1980_v36, %v2922_v59  ;;  %v2013_v41 = vrot.slane %v1997_v37, %v2922_v59  ;;  %v1869_v42 = vpop.f32.mrb[28].mxu0  ;;  %v2054_v43 = vmin.f32 %v2051_v38, 1.0 }
 0x357   :  { %v1871_v45 = vpop.f32.mrb[29].mxu0 }
 0x358   :  { %2574 = shalt.err (!%p2571_p10)
}
 0x359   :  { %s2575_s24 = scalar_lea.hbm %s2996_s12, 128 }
 0x35a   :  { %p2576_p11 = scmp.ne.s32.totalorder %s2996_s12, %s2575_s24  ;;  %p2579_p12 = scmp.lt.u32.totalorder %s2575_s24, %s2996_s12 }
 0x35c   :  { %p2581_p13 = pnand %p2579_p12, %p2576_p11 }
 0x35e   :  { %2584 = shalt.err (!%p2581_p13)
}
 0x35f   :  { %2079 = dma.vmem_to_hbm [thread:$0]  %s2077_s5, 128, %s2996_s12, [#allocation13]   ;;  %v1995_v21 = vcombine.low %v1987_v39, %v1994_v40  ;;  %v2028_v46 = vcombine.low %v2006_v33, %v2013_v41  ;;  %v2020_v50 = vrot.slane %v1998_v49, %v2922_v59  ;;  %v1999_v51 = vcombine.low %v1869_v42, %v1871_v45  ;;  %2057 = vst [vmem:[#allocation14] sm:$0xff] %v2054_v43  ;;  %v993_v60 = vld [vmem:[%s2993_s9 + $0x10] sm:$0xff] }
 0x360   :  { %s2631_s25 = smov [#allocation14]  }
 0x361   :  { %v2049_v52 = vadd.f32 %v1995_v21, %v992_v44  ;;  %v2027_v53 = vrot.slane %v1999_v51, %v2922_v59  ;;  %v2036_v56 = vrot.slane %v2028_v46, %v2922_v59  ;;  %s2086_s27 = sshll.u32 %s2631_s25, 4  ;;  %s2087_s27 = int_to_ptr.vmem [resolvable:$true] %s2086_s27 }
 0x362   :  { %s2585_s29 = scalar_lea.vmem %s2087_s27, 384  ;;  %p2590_p1 = scmp.lt.s32.totalorder %s2087_s27, %s2087_s27 }
 0x363   :  { %v2029_v54 = vcombine.low %v2020_v50, %v2027_v53  ;;  %v2052_v55 = vmax.f32 %v2049_v52, 0.0  ;;  %p2586_p0 = scmp.ne.s32.totalorder %s2087_s27, %s2585_s29  ;;  %p2591_p2 = scmp.lt.s32.totalorder %s2585_s29, %s2585_s29 }
 0x365   :  { %v2043_v57 = vrot.slane %v2029_v54, %v2922_v59  ;;  %v2055_v58 = vmin.f32 %v2052_v55, 1.0  ;;  %p2592_p3 = por %p2591_p2, %p2590_p1 }
 0x367   :  { %v2044_v61 = vcombine.low %v2036_v56, %v2043_v57  ;;  %2058 = vst [vmem:[#allocation14 + $0x8] sm:$0xff] %v2055_v58  ;;  %p2593_p4 = pnand %p2592_p3, %p2586_p0 }
 0x369   :  { %v2050_v47 = vadd.f32 %v2044_v61, %v993_v60 }
 0x36b   :  { %v2053_v48 = vmax.f32 %v2050_v47, 0.0 }
 0x36d   :  { %v2056_v49 = vmin.f32 %v2053_v48, 1.0 }
 0x36f   :  { %2059 = vst [vmem:[#allocation14 + $0x10] sm:$0xff] %v2056_v49 }
 0x370   :  { %2596 = shalt.err (!%p2593_p4)
}
 0x371   :  { %s2597_s9 = scalar_lea.hbm %s2997_s13, 384 }
 0x372   :  { %p2598_p5 = scmp.ne.s32.totalorder %s2997_s13, %s2597_s9  ;;  %p2601_p6 = scmp.lt.u32.totalorder %s2597_s9, %s2997_s13 }
 0x374   :  { %p2603_p7 = pnand %p2601_p6, %p2598_p5 }
 0x376   :  { %2606 = shalt.err (!%p2603_p7)
}
 0x377   :  { %2089 = dma.vmem_to_hbm [thread:$0]  %s2087_s27, 384, %s2997_s13, [#allocation13]  }
 0x378   :  { %2613 = dma.done.wait [#allocation4], 512  }
 0x379   :  { %2614 = vsyncadd [#allocation4], 4294966784 }
 0x37a   :  { %2615 = dma.done.wait [#allocation13], 512  }
 0x37b   :  { %2616 = vsyncadd [#allocation13], 4294966784 }
 0x37c   :  { %2099 = vsyncpa [#allocation3], 1 }
 0x37d   :  { %2100 = vsyncpa [#allocation6], 1 }
 0x37e   :  { %2101 = vsyncpa [#allocation9], 1 }
 0x37f   :  { %2102 = vsyncpa [#allocation4], 1 }
 0x380   :  { %2103 = vsyncpa [#allocation13], 1 }

</bundles_post_ra>
